<compile_context>
chip_gen: v5e
topology: v5e:2x2
jax: 0.10.0
libtpu: 0.0.40
codegen_flags: <defaults>
</compile_context>

<pallas_src>
import functools

import jax
import jax.numpy as jnp
from jax import lax
from jax.experimental import pallas as pl
from jax.experimental.pallas import tpu as pltpu


def _round_up(x, m):
    return (x + m - 1) // m * m


def _vmem_budget_and_limit():
    """(activation budget for tile sizing, compiler vmem_limit_bytes)."""
    try:
        cap = int(pltpu.get_tpu_info().vmem_capacity_bytes)
    except Exception:
        cap = 64 * 1024 * 1024          # conservative fallback (v7x per-TC VMEM)
    budget = int(cap * 0.55)            # activations / intermediates
    limit = int(cap * 0.70)             # headroom for weights + compiler scratch
    return budget, limit


# ----------------------------------------------------------------------------
# Pallas kernel: SharedMLP (1x1 conv, folded BN, ReLU) stack + max over nsample
# ----------------------------------------------------------------------------
def _make_mlp_max_kernel(num_layers, tile_p, ns):
    def kernel(*refs):
        x_ref = refs[0]
        out_ref = refs[-1]
        params = refs[1:-1]                      # [w0, b0, w1, b1, ...]

        x = x_ref[0]                             # (tile_p*ns, cin) bf16

        # Intermediate layers: MXU matmul (f32 acc) + bf16 bias/ReLU epilogue.
        for l in range(num_layers - 1):
            w = params[2 * l][...]               # (cin_l, cout_pad_l) bf16, BN folded
            b = params[2 * l + 1][...]           # (1, cout_pad_l)    bf16
            y = jnp.dot(x, w, preferred_element_type=jnp.float32)
            # bf16 epilogue (halves VPU op count on v6e/v7x; correct on v5e too).
            x = jnp.maximum(y.astype(jnp.bfloat16) + b, 0.0)

        # Last layer: matmul, then hoist the ns-max ABOVE bias+ReLU
        # (bias is per-channel, ReLU monotone -> identical result, ns x less
        #  elementwise work: runs on tile_p rows instead of tile_p*ns).
        w = params[2 * (num_layers - 1)][...]    # (cin_L, cout_pad) bf16
        b = params[2 * (num_layers - 1) + 1][...]  # (1, cout_pad)   f32
        y = jnp.dot(x, w, preferred_element_type=jnp.float32)   # (tile_p*ns, cout_pad)
        cout_pad = y.shape[-1]
        # ns is a multiple of 8 in practice -> layout-preserving reshape.
        y = jnp.max(y.reshape(tile_p, ns, cout_pad), axis=1)    # (tile_p, cout_pad)
        y = jnp.maximum(y + b, 0.0)

        # Store transposed (cout_pad, tile_p): lane-dense when tile_p % 128 == 0,
        # and the wrapper needs no post-kernel HBM transpose. XLU has slack here.
        out_ref[0] = y.T

    return kernel


def shared_mlp_max(grouped, kernel_layers, cout_last):
    """grouped: (B, P, ns, cin) bf16; kernel_layers: list of (w_bf16_padded, bias_padded).

    Returns (B, cout_last, P) f32 = max_over_samples(ReLU(BN(conv1x1(...)))).
    """
    B, P, ns, cin = grouped.shape
    num_layers = len(kernel_layers)
    cout_pad = kernel_layers[-1][0].shape[1]

    budget, vmem_limit = _vmem_budget_and_limit()

    # --- tile sizing from a VMEM budget (per matmul row = one (group, sample)) ---
    # * input block: bf16, lane-padded to 128 regardless of cin, double-buffered
    # * per layer: f32 accumulator + bf16 copy (counted live simultaneously: conservative)
    # * output block: f32 (cout_pad, tile_p), double-buffered, spread over ns rows
    bytes_per_row = 2 * 2 * 128
    bytes_per_row += sum(6 * w.shape[1] for (w, _) in kernel_layers)
    bytes_per_row += (2 * 4 * cout_pad) // max(ns, 1)
    max_rows = max(ns * 8, min(budget // bytes_per_row, 16384))

    lane_align = 128 if P >= 128 else 8          # 128 -> lane-dense transposed stores
    P_pad = _round_up(P, lane_align)

    tile_p = min(P_pad, max(lane_align, (max_rows // ns) // lane_align * lane_align))
    while P_pad % tile_p:                        # tile must divide the padded extent
        tile_p -= lane_align

    # Guarantee >=2 grid steps so both v7x TensorCores get work and the pipeline
    # can overlap DMA with compute (also helps v5e/v6e pipelining).
    if B * (P_pad // tile_p) < 2 and P_pad >= 2 * lane_align:
        tile_p = max(lane_align, (P_pad // 2) // lane_align * lane_align)
        while P_pad % tile_p:
            tile_p -= lane_align

    if P_pad != P:
        grouped = jnp.pad(grouped, ((0, 0), (0, P_pad - P), (0, 0), (0, 0)))

    # Flat per-batch activation slab: one big 2-D matmul per layer inside the kernel.
    x = grouped.reshape(B, P_pad * ns, cin)

    in_specs = [pl.BlockSpec((1, tile_p * ns, cin), lambda b, p: (b, p, 0))]
    args = [x]
    for (w, bias) in kernel_layers:
        in_specs.append(pl.BlockSpec(w.shape, lambda b, p: (0, 0)))     # resident
        in_specs.append(pl.BlockSpec(bias.shape, lambda b, p: (0, 0)))  # resident
        args.extend([w, bias])

    out = pl.pallas_call(
        _make_mlp_max_kernel(num_layers, tile_p, ns),
        out_shape=jax.ShapeDtypeStruct((B, cout_pad, P_pad), jnp.float32),
        grid=(B, P_pad // tile_p),
        in_specs=in_specs,
        out_specs=pl.BlockSpec((1, cout_pad, tile_p), lambda b, p: (b, 0, p)),
        compiler_params=pltpu.CompilerParams(
            dimension_semantics=("parallel", "parallel"),
            vmem_limit_bytes=vmem_limit),
    )(*args)

    return out[:, :cout_last, :P]                # (B, cout_last, P)


# ----------------------------------------------------------------------------
# Plain-JAX glue: FPS, ball query, grouping (data-dependent gathers)
# ----------------------------------------------------------------------------
def farthest_point_sample(xyz, npoint):
    """xyz: (B, N, 3) -> idx (B, npoint) int32. Deterministic start at point 0."""
    B, N, _ = xyz.shape

    def body(i, state):
        idxs, dist, farthest = state
        idxs = idxs.at[:, i].set(farthest)
        centroid = jnp.take_along_axis(xyz, farthest[:, None, None], axis=1)  # (B,1,3)
        d = jnp.sum((xyz - centroid) ** 2, axis=-1)                           # (B,N)
        dist = jnp.minimum(dist, d)
        farthest = jnp.argmax(dist, axis=-1).astype(jnp.int32)
        return idxs, dist, farthest

    idxs0 = jnp.zeros((B, npoint), jnp.int32)
    dist0 = jnp.full((B, N), 1e10, jnp.float32)
    far0 = jnp.zeros((B,), jnp.int32)
    idxs, _, _ = lax.fori_loop(0, npoint, body, (idxs0, dist0, far0))
    return idxs


def query_ball_point(radius, nsample, xyz, new_xyz):
    """xyz: (B,N,3), new_xyz: (B,S,3) -> indices (B,S,nsample) int32 (always in-bounds)."""
    B, N, _ = xyz.shape
    S = new_xyz.shape[1]
    sqrdists = jnp.sum((new_xyz[:, :, None, :] - xyz[:, None, :, :]) ** 2, axis=-1)
    group_idx = jnp.broadcast_to(jnp.arange(N, dtype=jnp.int32), (B, S, N))
    group_idx = jnp.where(sqrdists > radius ** 2, N, group_idx)
    group_idx = jnp.sort(group_idx, axis=-1)[:, :, :nsample]
    group_first = group_idx[:, :, :1]
    group_idx = jnp.where(group_idx == N, group_first, group_idx)
    # Degenerate centers with zero in-radius neighbors fall back to point 0
    # (matches the canonical CUDA ball_query initialization).
    return jnp.where(group_idx == N, 0, group_idx)


# ----------------------------------------------------------------------------
# Parameter construction (deterministic, synthetic) + BN folding / lane padding
# ----------------------------------------------------------------------------
def init_msg_params(key, mlps):
    """Raw per-scale params: list of (W:(cin,cout), gamma:(1,cout), beta:(1,cout))."""
    params = []
    for mlp in mlps:
        layers = []
        for cin, cout in zip(mlp[:-1], mlp[1:]):
            key, k_w, k_g, k_b = jax.random.split(key, 4)
            w = jax.random.normal(k_w, (cin, cout), jnp.float32) * 0.1
            gamma = 1.0 + 0.1 * jax.random.normal(k_g, (1, cout), jnp.float32)
            beta = 0.1 * jax.random.normal(k_b, (1, cout), jnp.float32)
            layers.append((w, gamma, beta))
        params.append(layers)
    return params


def prepare_kernel_params(raw_params, bn_eps=1e-5):
    """Fold eval-mode BN (mean=0, var=1) into weights, zero-pad channels to 128 lanes,
    cast weights to bf16 (intermediate biases bf16, last-layer bias f32).
    Returns per-scale (kernel_layers, cout_last)."""
    prepared = []
    for layers in raw_params:
        klayers = []
        prev_cout_pad = None
        n = len(layers)
        for li, (w, gamma, beta) in enumerate(layers):
            cin, cout = w.shape
            scale = gamma / jnp.sqrt(1.0 + bn_eps)        # running_var = 1
            w_fold = w * scale                            # fold BN scale into weights
            cin_pad = cin if prev_cout_pad is None else prev_cout_pad
            cout_pad = _round_up(cout, 128)
            w_pad = jnp.zeros((cin_pad, cout_pad), jnp.float32).at[:cin, :cout].set(w_fold)
            b_pad = jnp.zeros((1, cout_pad), jnp.float32).at[:, :cout].set(beta)
            is_last = li == n - 1
            b_kernel = b_pad if is_last else b_pad.astype(jnp.bfloat16)
            klayers.append((w_pad.astype(jnp.bfloat16), b_kernel))
            prev_cout_pad = cout_pad
        prepared.append((klayers, layers[-1][0].shape[1]))
    return prepared


# ----------------------------------------------------------------------------
# Full module forward
# ----------------------------------------------------------------------------
def base_pointnet_msg_forward(pc, feat, npoint, radius, nsamples, params):
    """
    pc   : (B, 3, N) float32
    feat : (B, C, N) float32 or None
    returns pc_sample (B, 3, npoint), cat_feat (B, sum(mlp[-1]), npoint)
    """
    B, _, N = pc.shape
    xyz = jnp.transpose(pc, (0, 2, 1))                               # (B, N, 3) (small)
    fps_idx = farthest_point_sample(xyz, npoint)                     # (B, npoint)
    new_xyz = jnp.take_along_axis(xyz, fps_idx[:, :, None], axis=1)  # (B, npoint, 3)
    pc_sample = jnp.transpose(new_xyz, (0, 2, 1))                    # (B, 3, npoint)

    # Channels-last point features so grouping directly produces the kernel layout
    # (no transpose of the big grouped tensor through HBM).
    if feat is not None:
        points_cl = jnp.concatenate([xyz, jnp.transpose(feat, (0, 2, 1))], axis=-1)
    else:
        points_cl = xyz
    cin = points_cl.shape[-1]

    cat_feat = []
    for i, (r, ns) in enumerate(zip(radius, nsamples)):
        idx = query_ball_point(r, ns, xyz, new_xyz)                  # (B, npoint, ns)
        grouped = jax.vmap(lambda p, ib: p[ib])(points_cl, idx)      # (B, npoint, ns, cin)
        centered_xyz = grouped[..., :3] - new_xyz[:, :, None, :]     # center coordinates
        if cin > 3:
            grouped = jnp.concatenate([centered_xyz, grouped[..., 3:]], axis=-1)
        else:
            grouped = centered_xyz

        klayers, cout_last = params[i]
        y = shared_mlp_max(grouped.astype(jnp.bfloat16), klayers, cout_last)
        cat_feat.append(y)                                           # (B, cout, npoint)

    return pc_sample, jnp.concatenate(cat_feat, axis=1)


# ----------------------------------------------------------------------------
if __name__ == "__main__":
    key = jax.random.PRNGKey(0)
    k_pc, k_feat, k_params = jax.random.split(key, 3)

    # Small, shape-consistent config (nsamples are multiples of 8 by design).
    B, C, N = 2, 4, 64
    npoint = 16
    radius = [0.2, 0.4]
    nsamples = [8, 16]
    mlps = [[3 + C, 16, 32], [3 + C, 16, 64]]

    pc = jax.random.uniform(k_pc, (B, 3, N), jnp.float32)            # points in [0,1)^3
    feat = jax.random.normal(k_feat, (B, C, N), jnp.float32)

    raw_params = init_msg_params(k_params, mlps)
    params = prepare_kernel_params(raw_params)

    fwd = jax.jit(functools.partial(
        base_pointnet_msg_forward,
        npoint=npoint, radius=radius, nsamples=nsamples, params=params))

    pc_sample, cat_feat = fwd(pc, feat)
    jax.block_until_ready((pc_sample, cat_feat))

    assert pc_sample.shape == (B, 3, npoint), pc_sample.shape
    assert cat_feat.shape == (B, sum(m[-1] for m in mlps), npoint), cat_feat.shape
    assert bool(jnp.all(jnp.isfinite(cat_feat)))

    print("KERNEL_OK")
</pallas_src>

<mosaic_0001>
module attributes {stable_mosaic.version = 11 : i64} {
  func.func @kernel(%arg0: i32, %arg1: i32, %arg2: memref<1x128x7xbf16, #tpu.memory_space<vmem>>, %arg3: memref<7x128xbf16, #tpu.memory_space<vmem>>, %arg4: memref<1x128xbf16, #tpu.memory_space<vmem>>, %arg5: memref<128x128xbf16, #tpu.memory_space<vmem>>, %arg6: memref<1x128xf32, #tpu.memory_space<vmem>>, %arg7: memref<1x128x16xf32, #tpu.memory_space<vmem>>) attributes {dimension_semantics = [#tpu.dimension_semantics<parallel>, #tpu.dimension_semantics<parallel>], iteration_bounds = array<i64: 2, 1>, scalar_prefetch = 0 : i64, scratch_operands = 0 : i64, tpu.core_type = #tpu.core_type<tc>, window_params = [{transform_indices = @transform_0, window_bounds = array<i64: 1, 128, 7>}, {pipeline_mode = #tpu.pipeline_mode<synchronous>, transform_indices = @transform_1, window_bounds = array<i64: 7, 128>}, {pipeline_mode = #tpu.pipeline_mode<synchronous>, transform_indices = @transform_2, window_bounds = array<i64: 1, 128>}, {pipeline_mode = #tpu.pipeline_mode<synchronous>, transform_indices = @transform_3, window_bounds = array<i64: 128, 128>}, {pipeline_mode = #tpu.pipeline_mode<synchronous>, transform_indices = @transform_4, window_bounds = array<i64: 1, 128>}, {transform_indices = @transform_5, window_bounds = array<i64: 1, 128, 16>}]} {
    %c0 = arith.constant 0 : index
    %c0_0 = arith.constant 0 : index
    %c0_1 = arith.constant 0 : index
    %0 = vector.load %arg2[%c0, %c0_0, %c0_1] : memref<1x128x7xbf16, #tpu.memory_space<vmem>>, vector<1x128x7xbf16>
    %1 = vector.shape_cast %0 : vector<1x128x7xbf16> to vector<128x7xbf16>
    %c0_2 = arith.constant 0 : index
    %c0_3 = arith.constant 0 : index
    %2 = vector.load %arg3[%c0_2, %c0_3] : memref<7x128xbf16, #tpu.memory_space<vmem>>, vector<7x128xbf16>
    %c0_4 = arith.constant 0 : index
    %c0_5 = arith.constant 0 : index
    %3 = vector.load %arg4[%c0_4, %c0_5] : memref<1x128xbf16, #tpu.memory_space<vmem>>, vector<1x128xbf16>
    %cst = arith.constant dense<0.000000e+00> : vector<128x128xf32>
    %4 = tpu.matmul %1, %2, %cst {dimension_numbers = #tpu.dot_dimension_numbers<[1], [0], [0], [1], [0, 0, 1, 1], [], []>} : vector<128x7xbf16>, vector<7x128xbf16>, vector<128x128xf32> -> vector<128x128xf32>
    %5 = arith.truncf %4 : vector<128x128xf32> to vector<128x128xbf16>
    %6 = vector.broadcast %3 : vector<1x128xbf16> to vector<128x128xbf16>
    %7 = arith.addf %5, %6 : vector<128x128xbf16>
    %cst_6 = arith.constant 0.000000e+00 : bf16
    %8 = vector.broadcast %cst_6 : bf16 to vector<128x128xbf16>
    %9 = arith.maximumf %7, %8 : vector<128x128xbf16>
    %c0_7 = arith.constant 0 : index
    %c0_8 = arith.constant 0 : index
    %10 = vector.load %arg5[%c0_7, %c0_8] : memref<128x128xbf16, #tpu.memory_space<vmem>>, vector<128x128xbf16>
    %c0_9 = arith.constant 0 : index
    %c0_10 = arith.constant 0 : index
    %11 = vector.load %arg6[%c0_9, %c0_10] : memref<1x128xf32, #tpu.memory_space<vmem>>, vector<1x128xf32>
    %cst_11 = arith.constant dense<0.000000e+00> : vector<128x128xf32>
    %12 = tpu.matmul %9, %10, %cst_11 {dimension_numbers = #tpu.dot_dimension_numbers<[1], [0], [0], [1], [0, 0, 1, 1], [], []>} : vector<128x128xbf16>, vector<128x128xbf16>, vector<128x128xf32> -> vector<128x128xf32>
    %13 = vector.shape_cast %12 : vector<128x128xf32> to vector<16x8x128xf32>
    %cst_12 = arith.constant dense<0xFF800000> : vector<16x128xf32>
    %14 = vector.multi_reduction <maximumf>, %13, %cst_12 [1] : vector<16x8x128xf32> to vector<16x128xf32>
    %15 = vector.broadcast %11 : vector<1x128xf32> to vector<16x128xf32>
    %16 = arith.addf %14, %15 : vector<16x128xf32>
    %cst_13 = arith.constant 0.000000e+00 : f32
    %17 = vector.broadcast %cst_13 : f32 to vector<16x128xf32>
    %18 = arith.maximumf %16, %17 : vector<16x128xf32>
    %19 = tpu.transpose %18, [1, 0] : vector<16x128xf32> -> vector<128x16xf32>
    %c0_14 = arith.constant 0 : index
    %c0_15 = arith.constant 0 : index
    %c0_16 = arith.constant 0 : index
    %20 = vector.load %arg7[%c0_14, %c0_15, %c0_16] : memref<1x128x16xf32, #tpu.memory_space<vmem>>, vector<1x128x16xf32>
    %21 = vector.shape_cast %20 : vector<1x128x16xf32> to vector<128x16xf32>
    %22 = vector.shape_cast %19 : vector<128x16xf32> to vector<1x128x16xf32>
    tpu.vector_store %arg7[%c0_14, %c0_15, %c0_16], %22 {strides = array<i32>} : memref<1x128x16xf32, #tpu.memory_space<vmem>>, vector<1x128x16xf32>,
    return
  }
  func.func @transform_0(%arg0: i32, %arg1: i32) -> (i32, i32, i32) {
    %c0_i32 = arith.constant 0 : i32
    %c0_i32_0 = arith.constant 0 : i32
    return %arg0, %arg1, %c0_i32 : i32, i32, i32
  }
  func.func @transform_1(%arg0: i32, %arg1: i32) -> (i32, i32) {
    %c0_i32 = arith.constant 0 : i32
    %c0_i32_0 = arith.constant 0 : i32
    %c0_i32_1 = arith.constant 0 : i32
    return %c0_i32, %c0_i32_0 : i32, i32
  }
  func.func @transform_2(%arg0: i32, %arg1: i32) -> (i32, i32) {
    %c0_i32 = arith.constant 0 : i32
    %c0_i32_0 = arith.constant 0 : i32
    %c0_i32_1 = arith.constant 0 : i32
    return %c0_i32, %c0_i32_0 : i32, i32
  }
  func.func @transform_3(%arg0: i32, %arg1: i32) -> (i32, i32) {
    %c0_i32 = arith.constant 0 : i32
    %c0_i32_0 = arith.constant 0 : i32
    %c0_i32_1 = arith.constant 0 : i32
    return %c0_i32, %c0_i32_0 : i32, i32
  }
  func.func @transform_4(%arg0: i32, %arg1: i32) -> (i32, i32) {
    %c0_i32 = arith.constant 0 : i32
    %c0_i32_0 = arith.constant 0 : i32
    %c0_i32_1 = arith.constant 0 : i32
    return %c0_i32, %c0_i32_0 : i32, i32
  }
  func.func @transform_5(%arg0: i32, %arg1: i32) -> (i32, i32, i32) {
    %c0_i32 = arith.constant 0 : i32
    %c0_i32_0 = arith.constant 0 : i32
    return %arg0, %c0_i32, %arg1 : i32, i32, i32
  }
}

module attributes {stable_mosaic.version = 11 : i64} {
  func.func @kernel(%arg0: i32, %arg1: i32, %arg2: memref<1x256x7xbf16, #tpu.memory_space<vmem>>, %arg3: memref<7x128xbf16, #tpu.memory_space<vmem>>, %arg4: memref<1x128xbf16, #tpu.memory_space<vmem>>, %arg5: memref<128x128xbf16, #tpu.memory_space<vmem>>, %arg6: memref<1x128xf32, #tpu.memory_space<vmem>>, %arg7: memref<1x128x16xf32, #tpu.memory_space<vmem>>) attributes {dimension_semantics = [#tpu.dimension_semantics<parallel>, #tpu.dimension_semantics<parallel>], iteration_bounds = array<i64: 2, 1>, scalar_prefetch = 0 : i64, scratch_operands = 0 : i64, tpu.core_type = #tpu.core_type<tc>, window_params = [{transform_indices = @transform_0, window_bounds = array<i64: 1, 256, 7>}, {pipeline_mode = #tpu.pipeline_mode<synchronous>, transform_indices = @transform_1, window_bounds = array<i64: 7, 128>}, {pipeline_mode = #tpu.pipeline_mode<synchronous>, transform_indices = @transform_2, window_bounds = array<i64: 1, 128>}, {pipeline_mode = #tpu.pipeline_mode<synchronous>, transform_indices = @transform_3, window_bounds = array<i64: 128, 128>}, {pipeline_mode = #tpu.pipeline_mode<synchronous>, transform_indices = @transform_4, window_bounds = array<i64: 1, 128>}, {transform_indices = @transform_5, window_bounds = array<i64: 1, 128, 16>}]} {
    %c0 = arith.constant 0 : index
    %c0_0 = arith.constant 0 : index
    %c0_1 = arith.constant 0 : index
    %0 = vector.load %arg2[%c0, %c0_0, %c0_1] : memref<1x256x7xbf16, #tpu.memory_space<vmem>>, vector<1x256x7xbf16>
    %1 = vector.shape_cast %0 : vector<1x256x7xbf16> to vector<256x7xbf16>
    %c0_2 = arith.constant 0 : index
    %c0_3 = arith.constant 0 : index
    %2 = vector.load %arg3[%c0_2, %c0_3] : memref<7x128xbf16, #tpu.memory_space<vmem>>, vector<7x128xbf16>
    %c0_4 = arith.constant 0 : index
    %c0_5 = arith.constant 0 : index
    %3 = vector.load %arg4[%c0_4, %c0_5] : memref<1x128xbf16, #tpu.memory_space<vmem>>, vector<1x128xbf16>
    %cst = arith.constant dense<0.000000e+00> : vector<256x128xf32>
    %4 = tpu.matmul %1, %2, %cst {dimension_numbers = #tpu.dot_dimension_numbers<[1], [0], [0], [1], [0, 0, 1, 1], [], []>} : vector<256x7xbf16>, vector<7x128xbf16>, vector<256x128xf32> -> vector<256x128xf32>
    %5 = arith.truncf %4 : vector<256x128xf32> to vector<256x128xbf16>
    %6 = vector.broadcast %3 : vector<1x128xbf16> to vector<256x128xbf16>
    %7 = arith.addf %5, %6 : vector<256x128xbf16>
    %cst_6 = arith.constant 0.000000e+00 : bf16
    %8 = vector.broadcast %cst_6 : bf16 to vector<256x128xbf16>
    %9 = arith.maximumf %7, %8 : vector<256x128xbf16>
    %c0_7 = arith.constant 0 : index
    %c0_8 = arith.constant 0 : index
    %10 = vector.load %arg5[%c0_7, %c0_8] : memref<128x128xbf16, #tpu.memory_space<vmem>>, vector<128x128xbf16>
    %c0_9 = arith.constant 0 : index
    %c0_10 = arith.constant 0 : index
    %11 = vector.load %arg6[%c0_9, %c0_10] : memref<1x128xf32, #tpu.memory_space<vmem>>, vector<1x128xf32>
    %cst_11 = arith.constant dense<0.000000e+00> : vector<256x128xf32>
    %12 = tpu.matmul %9, %10, %cst_11 {dimension_numbers = #tpu.dot_dimension_numbers<[1], [0], [0], [1], [0, 0, 1, 1], [], []>} : vector<256x128xbf16>, vector<128x128xbf16>, vector<256x128xf32> -> vector<256x128xf32>
    %13 = vector.shape_cast %12 : vector<256x128xf32> to vector<16x16x128xf32>
    %cst_12 = arith.constant dense<0xFF800000> : vector<16x128xf32>
    %14 = vector.multi_reduction <maximumf>, %13, %cst_12 [1] : vector<16x16x128xf32> to vector<16x128xf32>
    %15 = vector.broadcast %11 : vector<1x128xf32> to vector<16x128xf32>
    %16 = arith.addf %14, %15 : vector<16x128xf32>
    %cst_13 = arith.constant 0.000000e+00 : f32
    %17 = vector.broadcast %cst_13 : f32 to vector<16x128xf32>
    %18 = arith.maximumf %16, %17 : vector<16x128xf32>
    %19 = tpu.transpose %18, [1, 0] : vector<16x128xf32> -> vector<128x16xf32>
    %c0_14 = arith.constant 0 : index
    %c0_15 = arith.constant 0 : index
    %c0_16 = arith.constant 0 : index
    %20 = vector.load %arg7[%c0_14, %c0_15, %c0_16] : memref<1x128x16xf32, #tpu.memory_space<vmem>>, vector<1x128x16xf32>
    %21 = vector.shape_cast %20 : vector<1x128x16xf32> to vector<128x16xf32>
    %22 = vector.shape_cast %19 : vector<128x16xf32> to vector<1x128x16xf32>
    tpu.vector_store %arg7[%c0_14, %c0_15, %c0_16], %22 {strides = array<i32>} : memref<1x128x16xf32, #tpu.memory_space<vmem>>, vector<1x128x16xf32>,
    return
  }
  func.func @transform_0(%arg0: i32, %arg1: i32) -> (i32, i32, i32) {
    %c0_i32 = arith.constant 0 : i32
    %c0_i32_0 = arith.constant 0 : i32
    return %arg0, %arg1, %c0_i32 : i32, i32, i32
  }
  func.func @transform_1(%arg0: i32, %arg1: i32) -> (i32, i32) {
    %c0_i32 = arith.constant 0 : i32
    %c0_i32_0 = arith.constant 0 : i32
    %c0_i32_1 = arith.constant 0 : i32
    return %c0_i32, %c0_i32_0 : i32, i32
  }
  func.func @transform_2(%arg0: i32, %arg1: i32) -> (i32, i32) {
    %c0_i32 = arith.constant 0 : i32
    %c0_i32_0 = arith.constant 0 : i32
    %c0_i32_1 = arith.constant 0 : i32
    return %c0_i32, %c0_i32_0 : i32, i32
  }
  func.func @transform_3(%arg0: i32, %arg1: i32) -> (i32, i32) {
    %c0_i32 = arith.constant 0 : i32
    %c0_i32_0 = arith.constant 0 : i32
    %c0_i32_1 = arith.constant 0 : i32
    return %c0_i32, %c0_i32_0 : i32, i32
  }
  func.func @transform_4(%arg0: i32, %arg1: i32) -> (i32, i32) {
    %c0_i32 = arith.constant 0 : i32
    %c0_i32_0 = arith.constant 0 : i32
    %c0_i32_1 = arith.constant 0 : i32
    return %c0_i32, %c0_i32_0 : i32, i32
  }
  func.func @transform_5(%arg0: i32, %arg1: i32) -> (i32, i32, i32) {
    %c0_i32 = arith.constant 0 : i32
    %c0_i32_0 = arith.constant 0 : i32
    return %arg0, %c0_i32, %arg1 : i32, i32, i32
  }
}

</mosaic_0001>

<bundles_post_ra>
// kernel: custom-call.8
= control target key start
LH: loop header
LB: loop body
LE: loop exit
PB: predicated region body
PF: predicated region fallthrough
CT: control target
= control target key end

     0   :  { %s6_s0 = inlined_call_operand.vmem [shape: f32[2,64], index: 0, kind: output, shape index: {}]  }

// kernel: base_pointnet_msg_forward.2
= control target key start
LH: loop header
LB: loop body
LE: loop exit
PB: predicated region body
PF: predicated region fallthrough
CT: control target
= control target key end

     0   :  { %s1132_s18 = smov 0   ;;  %s1134_s19 = smov 0   ;;  %s1294_s0 = inlined_call_operand.vmem [shape: bf16[2,128,7], index: 0, kind: input, shape index: {}]   ;;  %s1295_s1 = inlined_call_operand.vmem [shape: bf16[7,128], index: 1, kind: input, shape index: {}]   ;;  %s1296_s2 = inlined_call_operand.vmem [shape: bf16[1,128], index: 2, kind: input, shape index: {}]   ;;  %s1297_s3 = inlined_call_operand.vmem [shape: bf16[128,128], index: 3, kind: input, shape index: {}]   ;;  %s1298_s4 = inlined_call_operand.vmem [shape: f32[1,128], index: 4, kind: input, shape index: {}]   ;;  %s1299_s5 = inlined_call_operand.vmem [shape: f32[2,128,16], index: 5, kind: output, shape index: {}]  }
   0x1   :  { %s1136_s20 = smov 0  }
   0x2 LB: > { %s27_s21 = sadd.s32 1, %s1095_s19  ;;  %p944_p0 = scmp.ge.s32.totalorder %s1099_s20, 1  ;;  %s1099_s20 = sphi %s1136_s20, %s15_s20   ;;  %s1095_s19 = sphi %s1134_s19, %s1301_s19   ;;  %s1091_s18 = sphi %s1132_s18, %s1300_s18  }
   0x3   : > { %p29_p1 = scmp.ge.s32.totalorder %s27_s21, 2  ;;  %p208_p2 = scmp.lt.s32.totalorder %s1099_s20, 3 }
   0x5   : > { %s1303_s21 = smov (%p29_p1, %s27_s21), 0  ;;  %p209_p3 = pnand %p944_p0, %p208_p2 }
   0x6   : > { %p244_p4 = scmp.lt.s32.totalorder (!%p209_p3), %s1091_s18, 1 }
   0x7   : > { %212 = sbr.rel (%p209_p3) target bundleno = 713 (0x2c9), region = 40 }
   0xc   : > { %v278_v0 = vld [vmem:[%s1295_s1] sm:$0xf]  ;;  %vm345_vm0 = vcmask 1042432   ;;  %vm346_vm1 = vcmask 1043456   ;;  %v1101_v1 = vmov 65535   ;;  %s1305_s18 = smov (!%p244_p4, %s1091_s18), 1 }
   0xd   : > { %v347_v2 = vsel %vm345_vm0, 4294967295, %v1101_v1  ;;  %s1023_s24 = sshll.u32 %s1305_s18, 6  ;;  %vm320_vm2 = vcmask 56320   ;;  %v1040_v9 = vld [vmem:[%s1297_s3 + $0x38] sm:$0xff]  ;;  %v1039_v10 = vld [vmem:[%s1297_s3 + $0x30] sm:$0xff]  ;;  %v1038_v11 = vld [vmem:[%s1297_s3 + $0x28] sm:$0xff] }
   0xe   : > { %v348_v3 = vsel %vm346_vm1, %v347_v2, 0  ;;  %s251_s27 = scalar_lea.vmem %s1294_s0, %s1023_s24  ;;  %575 = vmatpush.bf16.msra.mxu1 %v1040_v9  ;;  %1042 = vmatpush.bf16.msra.mxu2 %v1040_v9  ;;  %v1037_v16 = vld [vmem:[%s1297_s3 + $0x20] sm:$0xff]  ;;  %v1036_v17 = vld [vmem:[%s1297_s3 + $0x18] sm:$0xff]  ;;  %v1035_v18 = vld [vmem:[%s1297_s3 + $0x10] sm:$0xff]  ;;  %vm772_vm3 = vcmask 1041409   ;;  %vm775_vm4 = vcmask 1042434  }
   0xf   : > { %v350_v4 = vand.u32 %v348_v3, %v278_v0  ;;  %v1025_v5 = vld [vmem:[%s251_s27] sm:$0xff]  ;;  %v1026_v6 = vld [vmem:[%s251_s27 + $0x8] sm:$0xff]  ;;  %v1027_v7 = vld [vmem:[%s251_s27 + $0x10] sm:$0xff]  ;;  %vm778_vm5 = vcmask 1043459   ;;  %vm781_vm6 = vcmask 1044484   ;;  %vm784_vm7 = vcmask 1045509  }
  0x10   : > { %v1030_v8 = vld [vmem:[%s251_s27 + $0x28] sm:$0xff]  ;;  %v1028_v12 = vld [vmem:[%s251_s27 + $0x18] sm:$0xff]  ;;  %v1031_v13 = vld [vmem:[%s251_s27 + $0x30] sm:$0xff]  ;;  %vm787_vm8 = vcmask 1046534   ;;  %vm790_vm9 = vcmask 1047559   ;;  %vm840_vm10 = vcmask 130048  }
  0x11   : > { %359 = vmatpush.bf16.msra.mxu0 %v350_v4  ;;  %1041 = vmatpush.bf16.msra.mxu3 %v350_v4  ;;  %v1029_v14 = vld [vmem:[%s251_s27 + $0x20] sm:$0xff]  ;;  %v1032_v15 = vld [vmem:[%s251_s27 + $0x38] sm:$0xff]  ;;  %v1034_v19 = vld [vmem:[%s1297_s3 + $0x8] sm:$0xff]  ;;  %s1024_s27 = sshll.u32 %s1305_s18, 7 }
  0x12   : > { %576 = vmatpush.bf16.msra.mxu1 %v1039_v10  ;;  %1043 = vmatpush.bf16.msra.mxu2 %v1039_v10  ;;  %v1033_v20 = vld [vmem:[%s1297_s3] sm:$0xff]  ;;  %s1251_s30 = scalar_lea.vmem %s1299_s5, %s1024_s27 }
  0x13   : > { %v279_v21 = vld [vmem:[%s1296_s2] sm:$0x1] }
  0x14   : > { %981 = vmatmul.msk.bf16.vlgmr.msra.gmra.mxu0 %vm320_vm2, %v1025_v5  ;;  %986 = vmatmul.msk.bf16.vlgmr.msra.gmra.mxu3 %vm320_vm2, %v1030_v8  ;;  %v418_v22 = vpack.i.b16 %v279_v21, %v279_v21 }
  0x16   : > { %577 = vmatpush.bf16.msra.mxu1 %v1038_v11  ;;  %1044 = vmatpush.bf16.msra.mxu2 %v1038_v11  ;;  %v420_v25 = vperm.slane %v418_v22, 0 }
  0x18   : > { %v1194_v27 = vunpack.c.l.bf16 %v420_v25 }
  0x1a   : > { %578 = vmatpush.bf16.msra.mxu1 %v1037_v16  ;;  %1045 = vmatpush.bf16.msra.mxu2 %v1037_v16 }
  0x1e   : > { %579 = vmatpush.bf16.msra.mxu1 %v1036_v17  ;;  %1046 = vmatpush.bf16.msra.mxu2 %v1036_v17 }
  0x22   : > { %580 = vmatpush.bf16.msra.mxu1 %v1035_v18  ;;  %1047 = vmatpush.bf16.msra.mxu2 %v1035_v18 }
  0x24   : > { %982 = vmatmul.msk.bf16.gmra.mxu0 %vm320_vm2, %v1026_v6  ;;  %987 = vmatmul.msk.bf16.gmra.mxu3 %vm320_vm2, %v1031_v13 }
  0x26   : > { %581 = vmatpush.bf16.msra.mxu1 %v1034_v19  ;;  %1048 = vmatpush.bf16.msra.mxu2 %v1034_v19 }
  0x2a   : > { %582 = vmatpush.bf16.msra.mxu1 %v1033_v20  ;;  %1049 = vmatpush.bf16.msra.mxu2 %v1033_v20 }
  0x34   : > { %983 = vmatmul.msk.bf16.gmra.mxu0 %vm320_vm2, %v1027_v7  ;;  %988 = vmatmul.msk.bf16.gmra.mxu3 %vm320_vm2, %v1032_v15 }
  0x44   : > { %984 = vmatmul.msk.bf16.gmra.mxu0 %vm320_vm2, %v1028_v12 }
  0x54   : > { %985 = vmatmul.msk.bf16.gmra.mxu0 %vm320_vm2, %v1029_v14 }
  0x91   : > { %v361_v23 = vpop.f32.mrf.mxu0 }
  0x92   : > { %v401_v24 = vpack.c.bf16 %v361_v23, %v361_v23 }
  0x94   : > { %v421_v26 = vunpack.c.l.bf16 %v401_v24 }
  0x96   : > { %v438_v30 = vadd.f32 %v1194_v27, %v421_v26 }
  0x97   : > { %v386_v1 = vpop.f32.mrf.mxu3 }
  0x98   : > { %v486_v33 = vmax.f32 %v438_v30, 0.0  ;;  %v411_v18 = vpack.c.bf16 %v386_v1, %v386_v1 }
  0x99   : > { %v363_v28 = vpop.f32.mrf.mxu0 }
  0x9a   : > { %v402_v29 = vpack.c.bf16 %v363_v28, %v363_v28  ;;  %v431_v21 = vunpack.c.l.bf16 %v411_v18 }
  0x9c   : > { %v422_v31 = vunpack.c.l.bf16 %v402_v29  ;;  %v448_v23 = vadd.f32 %v1194_v27, %v431_v21 }
  0x9e   : > { %v439_v32 = vadd.f32 %v1194_v27, %v422_v31  ;;  %v496_v26 = vmax.f32 %v448_v23, 0.0 }
  0x9f   : > { %v388_v8 = vpop.f32.mrf.mxu3 }
  0xa0   : > { %v487_v34 = vmax.f32 %v439_v32, 0.0  ;;  %v412_v19 = vpack.c.bf16 %v388_v8, %v388_v8 }
  0xa1   : > { %v366_v35 = vpop.f32.mrf.mxu0 }
  0xa2   : > { %v502_v36 = vpack.c.bf16 %v487_v34, %v486_v33  ;;  %v403_v37 = vpack.c.bf16 %v366_v35, %v366_v35  ;;  %v432_v22 = vunpack.c.l.bf16 %v412_v19 }
  0xa4   : > { %583 = vmatmul.bf16.vlgmr.msra.gmra.mxu1 %v502_v36  ;;  %v423_v38 = vunpack.c.l.bf16 %v403_v37  ;;  %v449_v24 = vadd.f32 %v1194_v27, %v432_v22 }
  0xa6   : > { %v440_v41 = vadd.f32 %v1194_v27, %v423_v38  ;;  %v497_v28 = vmax.f32 %v449_v24, 0.0 }
  0xa7   : > { %v391_v17 = vpop.f32.mrf.mxu3 }
  0xa8   : > { %v488_v44 = vmax.f32 %v440_v41, 0.0  ;;  %v413_v29 = vpack.c.bf16 %v391_v17, %v391_v17  ;;  %v507_v31 = vpack.c.bf16 %v497_v28, %v496_v26  ;;  %v1215_v28 = vld [vmem:[%s1298_s4] ss:$0 sm:$0xff] }
  0xa9   : > { %v368_v39 = vpop.f32.mrf.mxu0 }
  0xaa   : > { %v404_v40 = vpack.c.bf16 %v368_v39, %v368_v39  ;;  %v433_v33 = vunpack.c.l.bf16 %v413_v29 }
  0xac   : > { %v424_v42 = vunpack.c.l.bf16 %v404_v40  ;;  %v450_v35 = vadd.f32 %v1194_v27, %v433_v33 }
  0xae   : > { %v441_v43 = vadd.f32 %v1194_v27, %v424_v42  ;;  %v498_v37 = vmax.f32 %v450_v35, 0.0 }
  0xaf   : > { %v393_v25 = vpop.f32.mrf.mxu3 }
  0xb0   : > { %v489_v45 = vmax.f32 %v441_v43, 0.0  ;;  %v414_v30 = vpack.c.bf16 %v393_v25, %v393_v25 }
  0xb1   : > { %v371_v46 = vpop.f32.mrf.mxu0 }
  0xb2   : > { %v503_v47 = vpack.c.bf16 %v489_v45, %v488_v44  ;;  %v405_v48 = vpack.c.bf16 %v371_v46, %v371_v46  ;;  %v434_v34 = vunpack.c.l.bf16 %v414_v30 }
  0xb4   : > { %588 = vmatmul.bf16.gmra.mxu1 %v503_v47  ;;  %v425_v49 = vunpack.c.l.bf16 %v405_v48  ;;  %v451_v36 = vadd.f32 %v1194_v27, %v434_v34 }
  0xb6   : > { %v442_v52 = vadd.f32 %v1194_v27, %v425_v49  ;;  %v499_v38 = vmax.f32 %v451_v36, 0.0 }
  0xb7   : > { %v396_v32 = vpop.f32.mrf.mxu3 }
  0xb8   : > { %v490_v55 = vmax.f32 %v442_v52, 0.0  ;;  %v415_v40 = vpack.c.bf16 %v396_v32, %v396_v32  ;;  %v508_v42 = vpack.c.bf16 %v499_v38, %v498_v37 }
  0xb9   : > { %v373_v50 = vpop.f32.mrf.mxu0 }
  0xba   : > { %v406_v51 = vpack.c.bf16 %v373_v50, %v373_v50  ;;  %v435_v43 = vunpack.c.l.bf16 %v415_v40 }
  0xbc   : > { %v426_v53 = vunpack.c.l.bf16 %v406_v51  ;;  %v452_v45 = vadd.f32 %v1194_v27, %v435_v43 }
  0xbe   : > { %v443_v54 = vadd.f32 %v1194_v27, %v426_v53  ;;  %v500_v48 = vmax.f32 %v452_v45, 0.0 }
  0xbf   : > { %v398_v39 = vpop.f32.mrf.mxu3 }
  0xc0   : > { %v491_v56 = vmax.f32 %v443_v54, 0.0  ;;  %v416_v41 = vpack.c.bf16 %v398_v39, %v398_v39 }
  0xc1   : > { %v376_v57 = vpop.f32.mrf.mxu0 }
  0xc2   : > { %v504_v58 = vpack.c.bf16 %v491_v56, %v490_v55  ;;  %v407_v59 = vpack.c.bf16 %v376_v57, %v376_v57  ;;  %v436_v44 = vunpack.c.l.bf16 %v416_v41 }
  0xc4   : > { %593 = vmatmul.bf16.gmra.mxu1 %v504_v58  ;;  %v427_v60 = vunpack.c.l.bf16 %v407_v59  ;;  %v453_v46 = vadd.f32 %v1194_v27, %v436_v44 }
  0xc6   : > { %v444_v63 = vadd.f32 %v1194_v27, %v427_v60  ;;  %v501_v47 = vmax.f32 %v453_v46, 0.0 }
  0xc8   : > { %v492_v3 = vmax.f32 %v444_v63, 0.0  ;;  %v509_v49 = vpack.c.bf16 %v501_v47, %v500_v48 }
  0xc9   : > { %v378_v61 = vpop.f32.mrf.mxu0 }
  0xca   : > { %v408_v62 = vpack.c.bf16 %v378_v61, %v378_v61 }
  0xcc   : > { %v428_v0 = vunpack.c.l.bf16 %v408_v62 }
  0xce   : > { %v445_v2 = vadd.f32 %v1194_v27, %v428_v0 }
  0xd0   : > { %v493_v4 = vmax.f32 %v445_v2, 0.0 }
  0xd1   : > { %v381_v5 = vpop.f32.mrf.mxu0 }
  0xd2   : > { %v505_v6 = vpack.c.bf16 %v493_v4, %v492_v3  ;;  %v409_v7 = vpack.c.bf16 %v381_v5, %v381_v5 }
  0xd4   : > { %598 = vmatmul.bf16.gmra.mxu1 %v505_v6  ;;  %v429_v9 = vunpack.c.l.bf16 %v409_v7 }
  0xd6   : > { %v446_v12 = vadd.f32 %v1194_v27, %v429_v9 }
  0xd8   : > { %v494_v16 = vmax.f32 %v446_v12, 0.0 }
  0xd9   : > { %v383_v10 = vpop.f32.mrf.mxu0 }
  0xda   : > { %v410_v11 = vpack.c.bf16 %v383_v10, %v383_v10 }
  0xdc   : > { %v430_v13 = vunpack.c.l.bf16 %v410_v11 }
  0xde   : > { %v447_v14 = vadd.f32 %v1194_v27, %v430_v13 }
  0xe0   : > { %v495_v15 = vmax.f32 %v447_v14, 0.0 }
  0xe2   : > { %v506_v20 = vpack.c.bf16 %v495_v15, %v494_v16 }
  0xe4   : > { %603 = vmatmul.bf16.vlgmr.msra.gmra.mxu2 %v506_v20 }
  0xf4   : > { %608 = vmatmul.bf16.gmra.mxu2 %v507_v31 }
 0x104   : > { %613 = vmatmul.bf16.gmra.mxu2 %v508_v42 }
 0x114   : > { %618 = vmatmul.bf16.gmra.mxu2 %v509_v49 }
 0x121   : > { %v584_v50 = vpop.f32.mrf.mxu1 }
 0x122   : > { %v624_v61 = vrot.slane %v584_v50, 4 }
 0x124   : > { %v625_v3 = vmax.f32 %v584_v50, %v624_v61 }
 0x126   : > { %v626_v10 = vrot.slane %v625_v3, 2 }
 0x128   : > { %v627_v18 = vmax.f32 %v625_v3, %v626_v10 }
 0x129   : > { %v586_v51 = vpop.f32.mrf.mxu1 }
 0x12a   : > { %v630_v55 = vrot.slane %v586_v51, 4  ;;  %v628_v26 = vrot.slane %v627_v18, 1 }
 0x12c   : > { %v631_v59 = vmax.f32 %v586_v51, %v630_v55  ;;  %v629_v38 = vmax.f32 %v627_v18, %v628_v26 }
 0x12e   : > { %v632_v27 = vrot.slane %v631_v59, 2  ;;  %v723_v48 = vadd.f32 %v1215_v28, %v629_v38 }
 0x130   : > { %v633_v7 = vmax.f32 %v631_v59, %v632_v27 }
 0x131   : > { %v589_v52 = vpop.f32.mrf.mxu1 }
 0x132   : > { %v636_v56 = vrot.slane %v589_v52, 4  ;;  %v634_v14 = vrot.slane %v633_v7, 1 }
 0x134   : > { %v637_v60 = vmax.f32 %v589_v52, %v636_v56  ;;  %v635_v22 = vmax.f32 %v633_v7, %v634_v14 }
 0x136   : > { %v638_v2 = vrot.slane %v637_v60, 2  ;;  %v724_v33 = vadd.f32 %v1215_v28, %v635_v22 }
 0x138   : > { %v639_v9 = vmax.f32 %v637_v60, %v638_v2  ;;  %v740_v43 = vmax.f32 %v724_v33, 0.0 }
 0x139   : > { %v591_v53 = vpop.f32.mrf.mxu1 }
 0x13a   : > { %v642_v57 = vrot.slane %v591_v53, 4  ;;  %v640_v17 = vrot.slane %v639_v9, 1  ;;  %v771_v52 = vrot.slane %v740_v43, 7 }
 0x13c   : > { %v643_v62 = vmax.f32 %v591_v53, %v642_v57  ;;  %v641_v25 = vmax.f32 %v639_v9, %v640_v17  ;;  %v739_v57 = vmax.f32 %v723_v48, 0.0 }
 0x13e   : > { %v644_v4 = vrot.slane %v643_v62, 2  ;;  %v725_v37 = vadd.f32 %v1215_v28, %v641_v25 }
 0x140   : > { %v645_v11 = vmax.f32 %v643_v62, %v644_v4  ;;  %v741_v46 = vmax.f32 %v725_v37, 0.0  ;;  %v773_v62 = vsel %vm772_vm3, %v771_v52, %v739_v57 }
 0x141   : > { %v594_v54 = vpop.f32.mrf.mxu1 }
 0x142   : > { %v648_v58 = vrot.slane %v594_v54, 4  ;;  %v646_v19 = vrot.slane %v645_v11, 1  ;;  %v774_v55 = vrot.slane %v741_v46, 6 }
 0x144   : > { %v649_v63 = vmax.f32 %v594_v54, %v648_v58  ;;  %v647_v29 = vmax.f32 %v645_v11, %v646_v19  ;;  %v776_v27 = vsel %vm775_vm4, %v774_v55, %v773_v62 }
 0x146   : > { %v650_v6 = vrot.slane %v649_v63, 2  ;;  %v726_v39 = vadd.f32 %v1215_v28, %v647_v29 }
 0x148   : > { %v651_v12 = vmax.f32 %v649_v63, %v650_v6  ;;  %v742_v49 = vmax.f32 %v726_v39, 0.0 }
 0x149   : > { %v596_v0 = vpop.f32.mrf.mxu1 }
 0x14a   : > { %v654_v1 = vrot.slane %v596_v0, 4  ;;  %v652_v21 = vrot.slane %v651_v12, 1  ;;  %v777_v58 = vrot.slane %v742_v49, 5 }
 0x14c   : > { %v655_v5 = vmax.f32 %v596_v0, %v654_v1  ;;  %v653_v31 = vmax.f32 %v651_v12, %v652_v21  ;;  %v779_v3 = vsel %vm778_vm5, %v777_v58, %v776_v27 }
 0x14e   : > { %v656_v8 = vrot.slane %v655_v5, 2  ;;  %v727_v42 = vadd.f32 %v1215_v28, %v653_v31 }
 0x150   : > { %v657_v15 = vmax.f32 %v655_v5, %v656_v8  ;;  %v743_v51 = vmax.f32 %v727_v42, 0.0 }
 0x151   : > { %v599_v13 = vpop.f32.mrf.mxu1 }
 0x152   : > { %v660_v16 = vrot.slane %v599_v13, 4  ;;  %v658_v23 = vrot.slane %v657_v15, 1  ;;  %v780_v60 = vrot.slane %v743_v51, 4 }
 0x154   : > { %v661_v20 = vmax.f32 %v599_v13, %v660_v16  ;;  %v659_v34 = vmax.f32 %v657_v15, %v658_v23  ;;  %v782_v4 = vsel %vm781_vm6, %v780_v60, %v779_v3 }
 0x156   : > { %v662_v24 = vrot.slane %v661_v20, 2  ;;  %v728_v44 = vadd.f32 %v1215_v28, %v659_v34 }
 0x158   : > { %v663_v30 = vmax.f32 %v661_v20, %v662_v24  ;;  %v744_v53 = vmax.f32 %v728_v44, 0.0 }
 0x159   : > { %v601_v32 = vpop.f32.mrf.mxu1 }
 0x15a   : > { %v664_v35 = vrot.slane %v663_v30, 1  ;;  %v666_v36 = vrot.slane %v601_v32, 4  ;;  %v783_v63 = vrot.slane %v744_v53, 3 }
 0x15c   : > { %v665_v40 = vmax.f32 %v663_v30, %v664_v35  ;;  %v667_v41 = vmax.f32 %v601_v32, %v666_v36  ;;  %v785_v5 = vsel %vm784_vm7, %v783_v63, %v782_v4 }
 0x15e   : > { %v668_v45 = vrot.slane %v667_v41, 2  ;;  %v729_v47 = vadd.f32 %v1215_v28, %v665_v40 }
 0x160   : > { %v669_v50 = vmax.f32 %v667_v41, %v668_v45  ;;  %v745_v56 = vmax.f32 %v729_v47, 0.0 }
 0x162   : > { %v670_v54 = vrot.slane %v669_v50, 1  ;;  %v786_v1 = vrot.slane %v745_v56, 2 }
 0x164   : > { %v671_v59 = vmax.f32 %v669_v50, %v670_v54  ;;  %v788_v7 = vsel %vm787_vm8, %v786_v1, %v785_v5 }
 0x166   : > { %v730_v61 = vadd.f32 %v1215_v28, %v671_v59 }
 0x167   : > { %v604_v0 = vpop.f32.mrf.mxu2 }
 0x168   : > { %v746_v2 = vmax.f32 %v730_v61, 0.0  ;;  %v672_v19 = vrot.slane %v604_v0, 4 }
 0x16a   : > { %v789_v6 = vrot.slane %v746_v2, 1  ;;  %v673_v26 = vmax.f32 %v604_v0, %v672_v19 }
 0x16c   : > { %v791_v8 = vsel %vm790_vm9, %v789_v6, %v788_v7  ;;  %v674_v35 = vrot.slane %v673_v26, 2 }
 0x16d   : > { %808 = vxpose.xlu0.b32.start [1/2] (short) %v791_v8, 128 }
 0x16e   : > { %v675_v43 = vmax.f32 %v673_v26, %v674_v35 }
 0x16f   : > { %v606_v9 = vpop.f32.mrf.mxu2 }
 0x170   : > { %v678_v13 = vrot.slane %v606_v9, 4  ;;  %v676_v51 = vrot.slane %v675_v43, 1 }
 0x172   : > { %v679_v17 = vmax.f32 %v606_v9, %v678_v13  ;;  %v677_v61 = vmax.f32 %v675_v43, %v676_v51 }
 0x174   : > { %v680_v23 = vrot.slane %v679_v17, 2  ;;  %v731_v6 = vadd.f32 %v1215_v28, %v677_v61 }
 0x176   : > { %v681_v32 = vmax.f32 %v679_v17, %v680_v23 }
 0x177   : > { %v609_v10 = vpop.f32.mrf.mxu2 }
 0x178   : > { %v684_v14 = vrot.slane %v609_v10, 4  ;;  %v682_v39 = vrot.slane %v681_v32, 1 }
 0x17a   : > { %v685_v18 = vmax.f32 %v609_v10, %v684_v14  ;;  %v683_v47 = vmax.f32 %v681_v32, %v682_v39 }
 0x17c   : > { %v686_v25 = vrot.slane %v685_v18, 2  ;;  %v732_v56 = vadd.f32 %v1215_v28, %v683_v47 }
 0x17e   : > { %v687_v34 = vmax.f32 %v685_v18, %v686_v25  ;;  %v748_v1 = vmax.f32 %v732_v56, 0.0 }
 0x17f   : > { %v611_v11 = vpop.f32.mrf.mxu2 }
 0x180   : > { %v690_v15 = vrot.slane %v611_v11, 4  ;;  %v688_v42 = vrot.slane %v687_v34, 1  ;;  %v792_v10 = vrot.slane %v748_v1, 7 }
 0x182   : > { %v691_v20 = vmax.f32 %v611_v11, %v690_v15  ;;  %v689_v50 = vmax.f32 %v687_v34, %v688_v42  ;;  %v747_v15 = vmax.f32 %v731_v6, 0.0 }
 0x184   : > { %v692_v29 = vrot.slane %v691_v20, 2  ;;  %v733_v60 = vadd.f32 %v1215_v28, %v689_v50  ;;  %v793_v19 = vsel %vm772_vm3, %v792_v10, %v747_v15 }
 0x186   : > { %v693_v36 = vmax.f32 %v691_v20, %v692_v29  ;;  %v749_v4 = vmax.f32 %v733_v60, 0.0 }
 0x187   : > { %v614_v12 = vpop.f32.mrf.mxu2 }
 0x188   : > { %v696_v16 = vrot.slane %v614_v12, 4  ;;  %v694_v44 = vrot.slane %v693_v36, 1  ;;  %v794_v13 = vrot.slane %v749_v4, 6 }
 0x18a   : > { %v697_v21 = vmax.f32 %v614_v12, %v696_v16  ;;  %v695_v52 = vmax.f32 %v693_v36, %v694_v44 }
 0x18c   : > { %v698_v31 = vrot.slane %v697_v21, 2  ;;  %v734_v62 = vadd.f32 %v1215_v28, %v695_v52 }
 0x18e   : > { %v699_v37 = vmax.f32 %v697_v21, %v698_v31  ;;  %v750_v7 = vmax.f32 %v734_v62, 0.0 }
 0x18f   : > { %v616_v22 = vpop.f32.mrf.mxu2 }
 0x190   : > { %v702_v24 = vrot.slane %v616_v22, 4  ;;  %v700_v46 = vrot.slane %v699_v37, 1  ;;  %v796_v16 = vrot.slane %v750_v7, 5 }
 0x192   : > { %v703_v30 = vmax.f32 %v616_v22, %v702_v24  ;;  %v701_v54 = vmax.f32 %v699_v37, %v700_v46  ;;  %v795_v22 = vsel %vm775_vm4, %v794_v13, %v793_v19 }
 0x193   : > { %v797_v25 = vsel %vm778_vm5, %v796_v16, %v795_v22 }
 0x194   : > { %v704_v33 = vrot.slane %v703_v30, 2  ;;  %v735_v27 = vadd.f32 %v1215_v28, %v701_v54 }
 0x196   : > { %v705_v40 = vmax.f32 %v703_v30, %v704_v33  ;;  %v751_v9 = vmax.f32 %v735_v27, 0.0 }
 0x197   : > { %v619_v38 = vpop.f32.mrf.mxu2 }
 0x198   : > { %v708_v41 = vrot.slane %v619_v38, 4  ;;  %v706_v48 = vrot.slane %v705_v40, 1  ;;  %v798_v18 = vrot.slane %v751_v9, 4 }
 0x19a   : > { %v709_v45 = vmax.f32 %v619_v38, %v708_v41  ;;  %v707_v57 = vmax.f32 %v705_v40, %v706_v48  ;;  %v799_v26 = vsel %vm781_vm6, %v798_v18, %v797_v25 }
 0x19c   : > { %v710_v49 = vrot.slane %v709_v45, 2  ;;  %v736_v2 = vadd.f32 %v1215_v28, %v707_v57 }
 0x19e   : > { %v711_v53 = vmax.f32 %v709_v45, %v710_v49  ;;  %v752_v11 = vmax.f32 %v736_v2, 0.0 }
 0x19f   : > { %v621_v55 = vpop.f32.mrf.mxu2 }
 0x1a0   : > { %v712_v58 = vrot.slane %v711_v53, 1  ;;  %v714_v59 = vrot.slane %v621_v55, 4  ;;  %v800_v20 = vrot.slane %v752_v11, 3 }
 0x1a2   : > { %v713_v63 = vmax.f32 %v711_v53, %v712_v58  ;;  %v715_v0 = vmax.f32 %v621_v55, %v714_v59  ;;  %v801_v29 = vsel %vm784_vm7, %v800_v20, %v799_v26 }
 0x1a4   : > { %v716_v3 = vrot.slane %v715_v0, 2  ;;  %v737_v5 = vadd.f32 %v1215_v28, %v713_v63 }
 0x1a6   : > { %v717_v8 = vmax.f32 %v715_v0, %v716_v3  ;;  %v753_v14 = vmax.f32 %v737_v5, 0.0 }
 0x1a8   : > { %v718_v12 = vrot.slane %v717_v8, 1  ;;  %v802_v23 = vrot.slane %v753_v14, 2 }
 0x1aa   : > { %v719_v17 = vmax.f32 %v717_v8, %v718_v12  ;;  %v803_v31 = vsel %vm787_vm8, %v802_v23, %v801_v29 }
 0x1ac   : > { %v738_v21 = vadd.f32 %v1215_v28, %v719_v17 }
 0x1ae   : > { %v754_v24 = vmax.f32 %v738_v21, 0.0 }
 0x1b0   : > { %v804_v30 = vrot.slane %v754_v24, 1 }
 0x1b2   : > { %v805_v32 = vsel %vm790_vm9, %v804_v30, %v803_v31 }
 0x1b3   : > { %809 = vxpose.xlu0.b32.end [2/2] (short) %v805_v32, 128 }
 0x24f   : > { %v824_v28 = vpop.trf.xlu0 }
 0x250   : > { %841 = vst.msk [vmem:[%s1251_s30] sm:$0xff] %vm840_vm10, %v824_v28 }
 0x257   : > { %v825_v33 = vpop.trf.xlu0 }
 0x258   : > { %842 = vst.msk [vmem:[%s1251_s30 + $0x8] sm:$0xff] %vm840_vm10, %v825_v33 }
 0x25f   : > { %v826_v34 = vpop.trf.xlu0 }
 0x260   : > { %843 = vst.msk [vmem:[%s1251_s30 + $0x10] sm:$0xff] %vm840_vm10, %v826_v34 }
 0x267   : > { %v827_v35 = vpop.trf.xlu0 }
 0x268   : > { %844 = vst.msk [vmem:[%s1251_s30 + $0x18] sm:$0xff] %vm840_vm10, %v827_v35 }
 0x26f   : > { %v828_v36 = vpop.trf.xlu0 }
 0x270   : > { %845 = vst.msk [vmem:[%s1251_s30 + $0x20] sm:$0xff] %vm840_vm10, %v828_v36 }
 0x277   : > { %v829_v37 = vpop.trf.xlu0 }
 0x278   : > { %846 = vst.msk [vmem:[%s1251_s30 + $0x28] sm:$0xff] %vm840_vm10, %v829_v37 }
 0x27f   : > { %v830_v38 = vpop.trf.xlu0 }
 0x280   : > { %847 = vst.msk [vmem:[%s1251_s30 + $0x30] sm:$0xff] %vm840_vm10, %v830_v38 }
 0x287   : > { %v831_v39 = vpop.trf.xlu0 }
 0x288   : > { %848 = vst.msk [vmem:[%s1251_s30 + $0x38] sm:$0xff] %vm840_vm10, %v831_v39 }
 0x28f   : > { %v832_v40 = vpop.trf.xlu0 }
 0x290   : > { %849 = vst.msk [vmem:[%s1251_s30 + $0x40] sm:$0xff] %vm840_vm10, %v832_v40 }
 0x297   : > { %v833_v41 = vpop.trf.xlu0 }
 0x298   : > { %850 = vst.msk [vmem:[%s1251_s30 + $0x48] sm:$0xff] %vm840_vm10, %v833_v41 }
 0x29f   : > { %v834_v42 = vpop.trf.xlu0 }
 0x2a0   : > { %851 = vst.msk [vmem:[%s1251_s30 + $0x50] sm:$0xff] %vm840_vm10, %v834_v42 }
 0x2a7   : > { %v835_v43 = vpop.trf.xlu0 }
 0x2a8   : > { %852 = vst.msk [vmem:[%s1251_s30 + $0x58] sm:$0xff] %vm840_vm10, %v835_v43 }
 0x2af   : > { %v836_v44 = vpop.trf.xlu0 }
 0x2b0   : > { %853 = vst.msk [vmem:[%s1251_s30 + $0x60] sm:$0xff] %vm840_vm10, %v836_v44 }
 0x2b7   : > { %v837_v45 = vpop.trf.xlu0 }
 0x2b8   : > { %854 = vst.msk [vmem:[%s1251_s30 + $0x68] sm:$0xff] %vm840_vm10, %v837_v45 }
 0x2bf   : > { %v838_v46 = vpop.trf.xlu0 }
 0x2c0   : > { %855 = vst.msk [vmem:[%s1251_s30 + $0x70] sm:$0xff] %vm840_vm10, %v838_v46 }
 0x2c7   : > { %v839_v47 = vpop.trf.xlu0 }
 0x2c8   : > { %856 = vst.msk [vmem:[%s1251_s30 + $0x78] sm:$0xff] %vm840_vm10, %v839_v47 }
 0x2c9 PF: > { %s15_s20 = sadd.s32 1, %s1099_s20   ;;  %s1300_s18 = smov %s1095_s19 }
 0x2ca   : > { %p12_p5 = scmp.ge.s32.totalorder %s15_s20, 4   ;;  %s1301_s19 = smov %s1303_s21 }
 0x2cc   :  { %14 = sbr.rel (!%p12_p5) target bundleno = 2 (0x2), region = 70 }

// kernel: base_pointnet_msg_forward.3
= control target key start
LH: loop header
LB: loop body
LE: loop exit
PB: predicated region body
PF: predicated region fallthrough
CT: control target
= control target key end

     0   :  { %s1460_s18 = smov 0   ;;  %s1462_s19 = smov 0   ;;  %s1670_s0 = inlined_call_operand.vmem [shape: bf16[2,256,7], index: 0, kind: input, shape index: {}]   ;;  %s1671_s1 = inlined_call_operand.vmem [shape: bf16[7,128], index: 1, kind: input, shape index: {}]   ;;  %s1672_s2 = inlined_call_operand.vmem [shape: bf16[1,128], index: 2, kind: input, shape index: {}]   ;;  %s1673_s3 = inlined_call_operand.vmem [shape: bf16[128,128], index: 3, kind: input, shape index: {}]   ;;  %s1674_s4 = inlined_call_operand.vmem [shape: f32[1,128], index: 4, kind: input, shape index: {}]   ;;  %s1675_s5 = inlined_call_operand.vmem [shape: f32[2,128,16], index: 5, kind: output, shape index: {}]  }
   0x1   :  { %s1464_s20 = smov 0  }
   0x2 LB: > { %s27_s21 = sadd.s32 1, %s1423_s19  ;;  %p1224_p0 = scmp.ge.s32.totalorder %s1427_s20, 1  ;;  %s1427_s20 = sphi %s1464_s20, %s15_s20   ;;  %s1423_s19 = sphi %s1462_s19, %s1677_s19   ;;  %s1419_s18 = sphi %s1460_s18, %s1676_s18  }
   0x3   : > { %p29_p1 = scmp.ge.s32.totalorder %s27_s21, 2  ;;  %p208_p2 = scmp.lt.s32.totalorder %s1427_s20, 3 }
   0x5   : > { %s1679_s21 = smov (%p29_p1, %s27_s21), 0  ;;  %p209_p3 = pnand %p1224_p0, %p208_p2 }
   0x6   : > { %p244_p4 = scmp.lt.s32.totalorder (!%p209_p3), %s1419_s18, 1 }
   0x7   : > { %212 = sbr.rel (%p209_p3) target bundleno = 843 (0x34b), region = 40 }
   0xc   : > { %v294_v0 = vld [vmem:[%s1671_s1] sm:$0xf]  ;;  %vm425_vm0 = vcmask 1042432   ;;  %vm426_vm1 = vcmask 1043456   ;;  %v1429_v1 = vmov 65535   ;;  %s1681_s18 = smov (!%p244_p4, %s1419_s18), 1 }
   0xd   : > { %v427_v2 = vsel %vm425_vm0, 4294967295, %v1429_v1  ;;  %s1343_s24 = sshll.u32 %s1681_s18, 7  ;;  %vm376_vm2 = vcmask 56320   ;;  %v1368_v11 = vld [vmem:[%s1673_s3 + $0x38] sm:$0xff]  ;;  %v1367_v12 = vld [vmem:[%s1673_s3 + $0x30] sm:$0xff]  ;;  %v1366_v13 = vld [vmem:[%s1673_s3 + $0x28] sm:$0xff] }
   0xe   : > { %v428_v3 = vsel %vm426_vm1, %v427_v2, 0  ;;  %s1489_s27 = scalar_lea.vmem %s1670_s0, %s1343_s24  ;;  %799 = vmatpush.bf16.msra.mxu1 %v1368_v11  ;;  %1370 = vmatpush.bf16.msra.mxu2 %v1368_v11  ;;  %v1365_v14 = vld [vmem:[%s1673_s3 + $0x20] sm:$0xff]  ;;  %v1364_v16 = vld [vmem:[%s1673_s3 + $0x18] sm:$0xff]  ;;  %v1363_v18 = vld [vmem:[%s1673_s3 + $0x10] sm:$0xff]  ;;  %vm1052_vm3 = vcmask 1041409   ;;  %vm1055_vm4 = vcmask 1042434   ;;  %s1627_s30 = scalar_lea.vmem %s1675_s5, %s1343_s24 }
   0xf   : > { %v430_v4 = vand.u32 %v428_v3, %v294_v0  ;;  %v1345_v5 = vld [vmem:[%s1489_s27] sm:$0xff]  ;;  %v1346_v6 = vld [vmem:[%s1489_s27 + $0x8] sm:$0xff]  ;;  %v1347_v7 = vld [vmem:[%s1489_s27 + $0x10] sm:$0xff]  ;;  %vm1058_vm5 = vcmask 1043459   ;;  %vm1061_vm6 = vcmask 1044484   ;;  %vm1064_vm7 = vcmask 1045509  }
  0x10   : > { %v1348_v8 = vld [vmem:[%s1489_s27 + $0x18] sm:$0xff]  ;;  %v1349_v9 = vld [vmem:[%s1489_s27 + $0x20] sm:$0xff]  ;;  %v1350_v10 = vld [vmem:[%s1489_s27 + $0x28] sm:$0xff]  ;;  %vm1067_vm8 = vcmask 1046534   ;;  %vm1070_vm9 = vcmask 1047559   ;;  %vm1120_vm10 = vcmask 130048  }
  0x11   : > { %439 = vmatpush.bf16.msra.mxu0 %v430_v4  ;;  %1369 = vmatpush.bf16.msra.mxu3 %v430_v4  ;;  %v1351_v15 = vld [vmem:[%s1489_s27 + $0x30] sm:$0xff]  ;;  %v1354_v17 = vld [vmem:[%s1489_s27 + $0x48] sm:$0xff]  ;;  %v1361_v20 = vld [vmem:[%s1673_s3] sm:$0xff] }
  0x12   : > { %800 = vmatpush.bf16.msra.mxu1 %v1367_v12  ;;  %1371 = vmatpush.bf16.msra.mxu2 %v1367_v12  ;;  %v1362_v19 = vld [vmem:[%s1673_s3 + $0x8] sm:$0xff]  ;;  %v1352_v21 = vld [vmem:[%s1489_s27 + $0x38] sm:$0xff]  ;;  %v1355_v22 = vld [vmem:[%s1489_s27 + $0x50] sm:$0xff] }
  0x13   : > { %v295_v23 = vld [vmem:[%s1672_s2] sm:$0x1]  ;;  %v1356_v29 = vld [vmem:[%s1489_s27 + $0x58] sm:$0xff]  ;;  %v1358_v54 = vld [vmem:[%s1489_s27 + $0x68] sm:$0xff] }
  0x14   : > { %1293 = vmatmul.msk.bf16.vlgmr.msra.gmra.mxu0 %vm376_vm2, %v1345_v5  ;;  %1302 = vmatmul.msk.bf16.vlgmr.msra.gmra.mxu3 %vm376_vm2, %v1354_v17  ;;  %v554_v24 = vpack.i.b16 %v295_v23, %v295_v23  ;;  %v1353_v25 = vld [vmem:[%s1489_s27 + $0x40] sm:$0xff]  ;;  %v1359_v2 = vld [vmem:[%s1489_s27 + $0x70] sm:$0xff] }
  0x15   : > { %v1357_v42 = vld [vmem:[%s1489_s27 + $0x60] sm:$0xff] }
  0x16   : > { %801 = vmatpush.bf16.msra.mxu1 %v1366_v13  ;;  %1372 = vmatpush.bf16.msra.mxu2 %v1366_v13  ;;  %v556_v28 = vperm.slane %v554_v24, 0 }
  0x18   : > { %v1542_v31 = vunpack.c.l.bf16 %v556_v28 }
  0x1a   : > { %802 = vmatpush.bf16.msra.mxu1 %v1365_v14  ;;  %1373 = vmatpush.bf16.msra.mxu2 %v1365_v14  ;;  %v1360_v14 = vld [vmem:[%s1489_s27 + $0x78] sm:$0xff] }
  0x1e   : > { %803 = vmatpush.bf16.msra.mxu1 %v1364_v16  ;;  %1374 = vmatpush.bf16.msra.mxu2 %v1364_v16 }
  0x22   : > { %804 = vmatpush.bf16.msra.mxu1 %v1363_v18  ;;  %1375 = vmatpush.bf16.msra.mxu2 %v1363_v18 }
  0x24   : > { %1294 = vmatmul.msk.bf16.gmra.mxu0 %vm376_vm2, %v1346_v6  ;;  %1303 = vmatmul.msk.bf16.gmra.mxu3 %vm376_vm2, %v1355_v22 }
  0x26   : > { %805 = vmatpush.bf16.msra.mxu1 %v1362_v19  ;;  %1376 = vmatpush.bf16.msra.mxu2 %v1362_v19 }
  0x2a   : > { %806 = vmatpush.bf16.msra.mxu1 %v1361_v20  ;;  %1377 = vmatpush.bf16.msra.mxu2 %v1361_v20 }
  0x34   : > { %1295 = vmatmul.msk.bf16.gmra.mxu0 %vm376_vm2, %v1347_v7  ;;  %1304 = vmatmul.msk.bf16.gmra.mxu3 %vm376_vm2, %v1356_v29 }
  0x44   : > { %1296 = vmatmul.msk.bf16.gmra.mxu0 %vm376_vm2, %v1348_v8  ;;  %1305 = vmatmul.msk.bf16.gmra.mxu3 %vm376_vm2, %v1357_v42 }
  0x54   : > { %1297 = vmatmul.msk.bf16.gmra.mxu0 %vm376_vm2, %v1349_v9  ;;  %1306 = vmatmul.msk.bf16.gmra.mxu3 %vm376_vm2, %v1358_v54 }
  0x64   : > { %1298 = vmatmul.msk.bf16.gmra.mxu0 %vm376_vm2, %v1350_v10  ;;  %1307 = vmatmul.msk.bf16.gmra.mxu3 %vm376_vm2, %v1359_v2 }
  0x74   : > { %1299 = vmatmul.msk.bf16.gmra.mxu0 %vm376_vm2, %v1351_v15  ;;  %1308 = vmatmul.msk.bf16.gmra.mxu3 %vm376_vm2, %v1360_v14 }
  0x84   : > { %1300 = vmatmul.msk.bf16.gmra.mxu0 %vm376_vm2, %v1352_v21 }
  0x91   : > { %v441_v26 = vpop.f32.mrf.mxu0 }
  0x92   : > { %v521_v27 = vpack.c.bf16 %v441_v26, %v441_v26 }
  0x94   : > { %1301 = vmatmul.msk.bf16.gmra.mxu0 %vm376_vm2, %v1353_v25  ;;  %v557_v30 = vunpack.c.l.bf16 %v521_v27 }
  0x96   : > { %v590_v34 = vadd.f32 %v1542_v31, %v557_v30 }
  0x98   : > { %v686_v37 = vmax.f32 %v590_v34, 0.0 }
  0x99   : > { %v443_v32 = vpop.f32.mrf.mxu0 }
  0x9a   : > { %v522_v33 = vpack.c.bf16 %v443_v32, %v443_v32 }
  0x9c   : > { %v558_v35 = vunpack.c.l.bf16 %v522_v33 }
  0x9e   : > { %v591_v36 = vadd.f32 %v1542_v31, %v558_v35 }
  0xa0   : > { %v687_v38 = vmax.f32 %v591_v36, 0.0 }
  0xa1   : > { %v446_v39 = vpop.f32.mrf.mxu0 }
  0xa2   : > { %v718_v40 = vpack.c.bf16 %v687_v38, %v686_v37  ;;  %v523_v41 = vpack.c.bf16 %v446_v39, %v446_v39 }
  0xa4   : > { %807 = vmatmul.bf16.vlgmr.msra.gmra.mxu1 %v718_v40  ;;  %v559_v43 = vunpack.c.l.bf16 %v523_v41 }
  0xa6   : > { %v592_v46 = vadd.f32 %v1542_v31, %v559_v43  ;;  %v486_v43 = vpop.f32.mrf.mxu3 }
  0xa8   : > { %v688_v49 = vmax.f32 %v592_v46, 0.0 }
  0xa9   : > { %v448_v44 = vpop.f32.mrf.mxu0 }
  0xaa   : > { %v524_v45 = vpack.c.bf16 %v448_v44, %v448_v44 }
  0xac   : > { %v560_v47 = vunpack.c.l.bf16 %v524_v45 }
  0xae   : > { %v593_v48 = vadd.f32 %v1542_v31, %v560_v47 }
  0xb0   : > { %v689_v50 = vmax.f32 %v593_v48, 0.0 }
  0xb1   : > { %v451_v51 = vpop.f32.mrf.mxu0 }
  0xb2   : > { %v719_v52 = vpack.c.bf16 %v689_v50, %v688_v49  ;;  %v525_v53 = vpack.c.bf16 %v451_v51, %v451_v51  ;;  %v488_v50 = vpop.f32.mrf.mxu3 }
  0xb4   : > { %812 = vmatmul.bf16.gmra.mxu1 %v719_v52  ;;  %v561_v55 = vunpack.c.l.bf16 %v525_v53 }
  0xb6   : > { %v594_v58 = vadd.f32 %v1542_v31, %v561_v55 }
  0xb8   : > { %v690_v61 = vmax.f32 %v594_v58, 0.0 }
  0xb9   : > { %v453_v56 = vpop.f32.mrf.mxu0 }
  0xba   : > { %v526_v57 = vpack.c.bf16 %v453_v56, %v453_v56 }
  0xbc   : > { %v562_v59 = vunpack.c.l.bf16 %v526_v57 }
  0xbe   : > { %v595_v60 = vadd.f32 %v1542_v31, %v562_v59 }
  0xc0   : > { %v691_v62 = vmax.f32 %v595_v60, 0.0  ;;  %v491_v60 = vpop.f32.mrf.mxu3 }
  0xc1   : > { %v456_v63 = vpop.f32.mrf.mxu0 }
  0xc2   : > { %v720_v0 = vpack.c.bf16 %v691_v62, %v690_v61  ;;  %v527_v1 = vpack.c.bf16 %v456_v63, %v456_v63 }
  0xc4   : > { %817 = vmatmul.bf16.gmra.mxu1 %v720_v0  ;;  %v563_v3 = vunpack.c.l.bf16 %v527_v1 }
  0xc6   : > { %v596_v6 = vadd.f32 %v1542_v31, %v563_v3 }
  0xc8   : > { %v692_v9 = vmax.f32 %v596_v6, 0.0  ;;  %v493_v2 = vpop.f32.mrf.mxu3 }
  0xc9   : > { %v458_v4 = vpop.f32.mrf.mxu0 }
  0xca   : > { %v528_v5 = vpack.c.bf16 %v458_v4, %v458_v4 }
  0xcc   : > { %v564_v7 = vunpack.c.l.bf16 %v528_v5 }
  0xce   : > { %v597_v8 = vadd.f32 %v1542_v31, %v564_v7 }
  0xd0   : > { %v693_v10 = vmax.f32 %v597_v8, 0.0 }
  0xd1   : > { %v461_v11 = vpop.f32.mrf.mxu0 }
  0xd2   : > { %v721_v12 = vpack.c.bf16 %v693_v10, %v692_v9  ;;  %v529_v13 = vpack.c.bf16 %v461_v11, %v461_v11  ;;  %v539_v9 = vpack.c.bf16 %v486_v43, %v486_v43  ;;  %v540_v10 = vpack.c.bf16 %v488_v50, %v488_v50 }
  0xd4   : > { %822 = vmatmul.bf16.gmra.mxu1 %v721_v12  ;;  %v565_v15 = vunpack.c.l.bf16 %v529_v13  ;;  %v496_v12 = vpop.f32.mrf.mxu3  ;;  %v575_v13 = vunpack.c.l.bf16 %v539_v9  ;;  %v576_v14 = vunpack.c.l.bf16 %v540_v10 }
  0xd6   : > { %v598_v18 = vadd.f32 %v1542_v31, %v565_v15 }
  0xd8   : > { %v694_v21 = vmax.f32 %v598_v18, 0.0 }
  0xd9   : > { %v463_v16 = vpop.f32.mrf.mxu0 }
  0xda   : > { %v530_v17 = vpack.c.bf16 %v463_v16, %v463_v16  ;;  %v608_v16 = vadd.f32 %v1542_v31, %v575_v13 }
  0xdc   : > { %v566_v19 = vunpack.c.l.bf16 %v530_v17  ;;  %v609_v17 = vadd.f32 %v1542_v31, %v576_v14 }
  0xde   : > { %v599_v20 = vadd.f32 %v1542_v31, %v566_v19  ;;  %v704_v19 = vmax.f32 %v608_v16, 0.0 }
  0xe0   : > { %v695_v22 = vmax.f32 %v599_v20, 0.0  ;;  %v705_v20 = vmax.f32 %v609_v17, 0.0 }
  0xe1   : > { %v466_v23 = vpop.f32.mrf.mxu0 }
  0xe2   : > { %v722_v24 = vpack.c.bf16 %v695_v22, %v694_v21  ;;  %v531_v25 = vpack.c.bf16 %v466_v23, %v466_v23  ;;  %v498_v21 = vpop.f32.mrf.mxu3 }
  0xe4   : > { %827 = vmatmul.bf16.gmra.mxu1 %v722_v24  ;;  %v567_v26 = vunpack.c.l.bf16 %v531_v25  ;;  %v541_v24 = vpack.c.bf16 %v491_v60, %v491_v60  ;;  %v542_v25 = vpack.c.bf16 %v493_v2, %v493_v2 }
  0xe6   : > { %v600_v29 = vadd.f32 %v1542_v31, %v567_v26  ;;  %v727_v26 = vpack.c.bf16 %v705_v20, %v704_v19 }
  0xe8   : > { %v696_v33 = vmax.f32 %v600_v29, 0.0  ;;  %v578_v29 = vunpack.c.l.bf16 %v542_v25 }
  0xe9   : > { %v468_v27 = vpop.f32.mrf.mxu0 }
  0xea   : > { %v532_v28 = vpack.c.bf16 %v468_v27, %v468_v27 }
  0xec   : > { %v568_v30 = vunpack.c.l.bf16 %v532_v28  ;;  %v577_v28 = vunpack.c.l.bf16 %v541_v24 }
  0xee   : > { %v601_v32 = vadd.f32 %v1542_v31, %v568_v30 }
  0xf0   : > { %v697_v34 = vmax.f32 %v601_v32, 0.0 }
  0xf1   : > { %v471_v35 = vpop.f32.mrf.mxu0 }
  0xf2   : > { %v723_v36 = vpack.c.bf16 %v697_v34, %v696_v33  ;;  %v533_v37 = vpack.c.bf16 %v471_v35, %v471_v35  ;;  %v501_v33 = vpop.f32.mrf.mxu3  ;;  %v610_v34 = vadd.f32 %v1542_v31, %v577_v28  ;;  %v611_v35 = vadd.f32 %v1542_v31, %v578_v29 }
  0xf3   : > { %v545_v9 = vpack.c.bf16 %v501_v33, %v501_v33 }
  0xf4   : > { %832 = vmatmul.bf16.gmra.mxu1 %v723_v36  ;;  %v569_v38 = vunpack.c.l.bf16 %v533_v37 }
  0xf5   : > { %v581_v14 = vunpack.c.l.bf16 %v545_v9 }
  0xf6   : > { %v602_v41 = vadd.f32 %v1542_v31, %v569_v38 }
  0xf7   : > { %v614_v20 = vadd.f32 %v1542_v31, %v581_v14 }
  0xf8   : > { %v698_v45 = vmax.f32 %v602_v41, 0.0  ;;  %v707_v41 = vmax.f32 %v611_v35, 0.0 }
  0xf9   : > { %v473_v39 = vpop.f32.mrf.mxu0 }
  0xfa   : > { %v534_v40 = vpack.c.bf16 %v473_v39, %v473_v39 }
  0xfc   : > { %v570_v42 = vunpack.c.l.bf16 %v534_v40  ;;  %v706_v40 = vmax.f32 %v610_v34, 0.0 }
  0xfe   : > { %v603_v44 = vadd.f32 %v1542_v31, %v570_v42 }
 0x100   : > { %v699_v46 = vmax.f32 %v603_v44, 0.0 }
 0x101   : > { %v476_v47 = vpop.f32.mrf.mxu0 }
 0x102   : > { %v724_v48 = vpack.c.bf16 %v699_v46, %v698_v45  ;;  %v535_v49 = vpack.c.bf16 %v476_v47, %v476_v47  ;;  %v543_v45 = vpack.c.bf16 %v496_v12, %v496_v12  ;;  %v544_v47 = vpack.c.bf16 %v498_v21, %v498_v21 }
 0x104   : > { %837 = vmatmul.bf16.gmra.mxu1 %v724_v48  ;;  %v571_v51 = vunpack.c.l.bf16 %v535_v49  ;;  %v728_v48 = vpack.c.bf16 %v707_v41, %v706_v40  ;;  %v503_v49 = vpop.f32.mrf.mxu3 }
 0x106   : > { %v604_v54 = vadd.f32 %v1542_v31, %v571_v51  ;;  %v1577_v51 = vld [vmem:[%s1674_s4] ss:$0 sm:$0xff] }
 0x108   : > { %v700_v57 = vmax.f32 %v604_v54, 0.0 }
 0x109   : > { %v478_v52 = vpop.f32.mrf.mxu0 }
 0x10a   : > { %v536_v53 = vpack.c.bf16 %v478_v52, %v478_v52 }
 0x10c   : > { %v572_v55 = vunpack.c.l.bf16 %v536_v53  ;;  %v579_v53 = vunpack.c.l.bf16 %v543_v45  ;;  %v506_v2 = vpop.f32.mrf.mxu3 }
 0x10d   : > { %v547_v34 = vpack.c.bf16 %v506_v2, %v506_v2 }
 0x10e   : > { %v605_v56 = vadd.f32 %v1542_v31, %v572_v55  ;;  %v580_v55 = vunpack.c.l.bf16 %v544_v47 }
 0x110   : > { %v701_v58 = vmax.f32 %v605_v56, 0.0 }
 0x111   : > { %v481_v59 = vpop.f32.mrf.mxu0 }
 0x112   : > { %v725_v61 = vpack.c.bf16 %v701_v58, %v700_v57  ;;  %v537_v62 = vpack.c.bf16 %v481_v59, %v481_v59  ;;  %v612_v59 = vadd.f32 %v1542_v31, %v579_v53 }
 0x114   : > { %842 = vmatmul.bf16.gmra.mxu1 %v725_v61  ;;  %v573_v63 = vunpack.c.l.bf16 %v537_v62  ;;  %v613_v61 = vadd.f32 %v1542_v31, %v580_v55  ;;  %v508_v17 = vpop.f32.mrf.mxu3 }
 0x116   : > { %v606_v3 = vadd.f32 %v1542_v31, %v573_v63 }
 0x118   : > { %v702_v7 = vmax.f32 %v606_v3, 0.0 }
 0x119   : > { %v483_v0 = vpop.f32.mrf.mxu0 }
 0x11a   : > { %v538_v1 = vpack.c.bf16 %v483_v0, %v483_v0 }
 0x11c   : > { %v574_v4 = vunpack.c.l.bf16 %v538_v1  ;;  %v511_v33 = vpop.f32.mrf.mxu3 }
 0x11e   : > { %v607_v5 = vadd.f32 %v1542_v31, %v574_v4  ;;  %v708_v4 = vmax.f32 %v612_v59, 0.0 }
 0x120   : > { %v703_v6 = vmax.f32 %v607_v5, 0.0  ;;  %v709_v5 = vmax.f32 %v613_v61, 0.0 }
 0x121   : > { %v808_v8 = vpop.f32.mrf.mxu1 }
 0x122   : > { %v726_v11 = vpack.c.bf16 %v703_v6, %v702_v7  ;;  %v729_v12 = vpack.c.bf16 %v709_v5, %v708_v4 }
 0x124   : > { %847 = vmatmul.bf16.vlgmr.msra.gmra.mxu2 %v726_v11  ;;  %v546_v11 = vpack.c.bf16 %v503_v49, %v503_v49  ;;  %v513_v47 = vpop.f32.mrf.mxu3 }
 0x125   : > { %v550_v55 = vpack.c.bf16 %v513_v47, %v513_v47 }
 0x126   : > { %v582_v16 = vunpack.c.l.bf16 %v546_v11 }
 0x127   : > { %v586_v59 = vunpack.c.l.bf16 %v550_v55 }
 0x129   : > { %v810_v15 = vpop.f32.mrf.mxu1 }
 0x12a   : > { %v888_v18 = vmax.f32 %v808_v8, %v810_v15 }
 0x12c   : > { %v889_v22 = vrot.slane %v888_v18, 4 }
 0x12e   : > { %v890_v27 = vmax.f32 %v888_v18, %v889_v22  ;;  %v615_v22 = vadd.f32 %v1542_v31, %v582_v16 }
 0x130   : > { %v891_v30 = vrot.slane %v890_v27, 2  ;;  %v711_v28 = vmax.f32 %v615_v22, 0.0 }
 0x131   : > { %v813_v23 = vpop.f32.mrf.mxu1 }
 0x132   : > { %v892_v37 = vmax.f32 %v890_v27, %v891_v30  ;;  %v710_v27 = vmax.f32 %v614_v20, 0.0 }
 0x134   : > { %852 = vmatmul.bf16.gmra.mxu2 %v727_v26  ;;  %v893_v42 = vrot.slane %v892_v37, 1 }
 0x136   : > { %v894_v50 = vmax.f32 %v892_v37, %v893_v42  ;;  %v730_v37 = vpack.c.bf16 %v711_v28, %v710_v27 }
 0x138   : > { %v1003_v56 = vadd.f32 %v1577_v51, %v894_v50 }
 0x139   : > { %v815_v32 = vpop.f32.mrf.mxu1 }
 0x13a   : > { %v895_v36 = vmax.f32 %v813_v23, %v815_v32  ;;  %v1019_v63 = vmax.f32 %v1003_v56, 0.0 }
 0x13c   : > { %v896_v38 = vrot.slane %v895_v36, 4 }
 0x13e   : > { %v897_v39 = vmax.f32 %v895_v36, %v896_v38  ;;  %v548_v36 = vpack.c.bf16 %v508_v17, %v508_v17 }
 0x140   : > { %v898_v43 = vrot.slane %v897_v39, 2  ;;  %v584_v41 = vunpack.c.l.bf16 %v548_v36 }
 0x141   : > { %v818_v44 = vpop.f32.mrf.mxu1 }
 0x142   : > { %v899_v46 = vmax.f32 %v897_v39, %v898_v43  ;;  %v583_v39 = vunpack.c.l.bf16 %v547_v34 }
 0x144   : > { %v900_v52 = vrot.slane %v899_v46, 1  ;;  %857 = vmatmul.bf16.gmra.mxu2 %v728_v48 }
 0x146   : > { %v901_v54 = vmax.f32 %v899_v46, %v900_v52  ;;  %v617_v46 = vadd.f32 %v1542_v31, %v584_v41 }
 0x148   : > { %v1004_v57 = vadd.f32 %v1577_v51, %v901_v54  ;;  %v713_v50 = vmax.f32 %v617_v46, 0.0  ;;  %v549_v54 = vpack.c.bf16 %v511_v33, %v511_v33 }
 0x149   : > { %v820_v58 = vpop.f32.mrf.mxu1 }
 0x14a   : > { %v1020_v60 = vmax.f32 %v1004_v57, 0.0  ;;  %v902_v62 = vmax.f32 %v818_v44, %v820_v58  ;;  %v616_v44 = vadd.f32 %v1542_v31, %v583_v39  ;;  %v516_v57 = vpop.f32.mrf.mxu3  ;;  %v585_v58 = vunpack.c.l.bf16 %v549_v54 }
 0x14c   : > { %v1051_v0 = vrot.slane %v1020_v60, 7  ;;  %v903_v1 = vrot.slane %v902_v62, 4  ;;  %v712_v49 = vmax.f32 %v616_v44, 0.0  ;;  %v618_v61 = vadd.f32 %v1542_v31, %v585_v58 }
 0x14e   : > { %v904_v3 = vmax.f32 %v902_v62, %v903_v1  ;;  %v1053_v6 = vsel %vm1052_vm3, %v1051_v0, %v1019_v63  ;;  %v731_v56 = vpack.c.bf16 %v713_v50, %v712_v49  ;;  %v619_v62 = vadd.f32 %v1542_v31, %v586_v59 }
 0x14f   : > { %v714_v63 = vmax.f32 %v618_v61, 0.0 }
 0x150   : > { %v905_v7 = vrot.slane %v904_v3, 2  ;;  %v715_v0 = vmax.f32 %v619_v62, 0.0 }
 0x151   : > { %v823_v8 = vpop.f32.mrf.mxu1 }
 0x152   : > { %v906_v10 = vmax.f32 %v904_v3, %v905_v7  ;;  %v518_v1 = vpop.f32.mrf.mxu3  ;;  %v551_v3 = vpack.c.bf16 %v516_v57, %v516_v57  ;;  %v732_v5 = vpack.c.bf16 %v715_v0, %v714_v63 }
 0x153   : > { %v552_v4 = vpack.c.bf16 %v518_v1, %v518_v1 }
 0x154   : > { %v907_v13 = vrot.slane %v906_v10, 1  ;;  %862 = vmatmul.bf16.gmra.mxu2 %v729_v12 }
 0x155   : > { %v588_v9 = vunpack.c.l.bf16 %v552_v4 }
 0x156   : > { %v908_v15 = vmax.f32 %v906_v10, %v907_v13 }
 0x157   : > { %v621_v14 = vadd.f32 %v1542_v31, %v588_v9 }
 0x158   : > { %v1005_v18 = vadd.f32 %v1577_v51, %v908_v15 }
 0x159   : > { %v825_v19 = vpop.f32.mrf.mxu1 }
 0x15a   : > { %v1021_v21 = vmax.f32 %v1005_v18, 0.0  ;;  %v909_v23 = vmax.f32 %v823_v8, %v825_v19  ;;  %v587_v8 = vunpack.c.l.bf16 %v551_v3  ;;  %v717_v19 = vmax.f32 %v621_v14, 0.0 }
 0x15c   : > { %v1054_v24 = vrot.slane %v1021_v21, 6  ;;  %v910_v25 = vrot.slane %v909_v23, 4  ;;  %v620_v13 = vadd.f32 %v1542_v31, %v587_v8 }
 0x15e   : > { %v911_v26 = vmax.f32 %v909_v23, %v910_v25  ;;  %v1056_v29 = vsel %vm1055_vm4, %v1054_v24, %v1053_v6  ;;  %v716_v21 = vmax.f32 %v620_v13, 0.0 }
 0x160   : > { %v912_v30 = vrot.slane %v911_v26, 2 }
 0x161   : > { %v828_v32 = vpop.f32.mrf.mxu1 }
 0x162   : > { %v913_v35 = vmax.f32 %v911_v26, %v912_v30  ;;  %v733_v26 = vpack.c.bf16 %v717_v19, %v716_v21 }
 0x164   : > { %v914_v38 = vrot.slane %v913_v35, 1  ;;  %867 = vmatmul.bf16.gmra.mxu2 %v730_v37 }
 0x166   : > { %v915_v40 = vmax.f32 %v913_v35, %v914_v38 }
 0x168   : > { %v1006_v42 = vadd.f32 %v1577_v51, %v915_v40 }
 0x169   : > { %v830_v43 = vpop.f32.mrf.mxu1 }
 0x16a   : > { %v1022_v45 = vmax.f32 %v1006_v42, 0.0  ;;  %v916_v6 = vmax.f32 %v828_v32, %v830_v43 }
 0x16c   : > { %v1057_v48 = vrot.slane %v1022_v45, 5  ;;  %v917_v10 = vrot.slane %v916_v6, 4 }
 0x16e   : > { %v1592_v52 = vsel %vm1058_vm5, %v1057_v48, %v1056_v29  ;;  %v918_v16 = vmax.f32 %v916_v6, %v917_v10 }
 0x170   : > { %v919_v22 = vrot.slane %v918_v16, 2 }
 0x171   : > { %v833_v53 = vpop.f32.mrf.mxu1 }
 0x172   : > { %v920_v27 = vmax.f32 %v918_v16, %v919_v22 }
 0x174   : > { %872 = vmatmul.bf16.gmra.mxu2 %v731_v56  ;;  %v921_v30 = vrot.slane %v920_v27, 1 }
 0x176   : > { %v922_v35 = vmax.f32 %v920_v27, %v921_v30 }
 0x178   : > { %v1007_v40 = vadd.f32 %v1577_v51, %v922_v35 }
 0x179   : > { %v835_v60 = vpop.f32.mrf.mxu1 }
 0x17a   : > { %v923_v7 = vmax.f32 %v833_v53, %v835_v60  ;;  %v1023_v45 = vmax.f32 %v1007_v40, 0.0 }
 0x17c   : > { %v924_v11 = vrot.slane %v923_v7, 4  ;;  %v1060_v50 = vrot.slane %v1023_v45, 4 }
 0x17e   : > { %v925_v17 = vmax.f32 %v923_v7, %v924_v11  ;;  %v1062_v58 = vsel %vm1061_vm6, %v1060_v50, %v1592_v52 }
 0x180   : > { %v926_v23 = vrot.slane %v925_v17, 2 }
 0x181   : > { %v838_v2 = vpop.f32.mrf.mxu1 }
 0x182   : > { %v927_v28 = vmax.f32 %v925_v17, %v926_v23 }
 0x184   : > { %877 = vmatmul.bf16.gmra.mxu2 %v732_v5  ;;  %v928_v32 = vrot.slane %v927_v28, 1 }
 0x186   : > { %v929_v36 = vmax.f32 %v927_v28, %v928_v32 }
 0x188   : > { %v1008_v41 = vadd.f32 %v1577_v51, %v929_v36 }
 0x189   : > { %v840_v12 = vpop.f32.mrf.mxu1 }
 0x18a   : > { %v930_v15 = vmax.f32 %v838_v2, %v840_v12  ;;  %v1024_v46 = vmax.f32 %v1008_v41, 0.0 }
 0x18c   : > { %v931_v18 = vrot.slane %v930_v15, 4  ;;  %v1063_v55 = vrot.slane %v1024_v46, 3 }
 0x18e   : > { %v932_v20 = vmax.f32 %v930_v15, %v931_v18  ;;  %v1065_v59 = vsel %vm1064_vm7, %v1063_v55, %v1062_v58 }
 0x190   : > { %v933_v24 = vrot.slane %v932_v20, 2 }
 0x191   : > { %v843_v25 = vpop.f32.mrf.mxu1 }
 0x192   : > { %v934_v29 = vmax.f32 %v932_v20, %v933_v24 }
 0x194   : > { %882 = vmatmul.bf16.gmra.mxu2 %v733_v26  ;;  %v935_v33 = vrot.slane %v934_v29, 1 }
 0x196   : > { %v936_v38 = vmax.f32 %v934_v29, %v935_v33 }
 0x198   : > { %v1009_v43 = vadd.f32 %v1577_v51, %v936_v38 }
 0x199   : > { %v845_v31 = vpop.f32.mrf.mxu1 }
 0x19a   : > { %v937_v34 = vmax.f32 %v843_v25, %v845_v31  ;;  %v1025_v48 = vmax.f32 %v1009_v43, 0.0 }
 0x19c   : > { %v938_v37 = vrot.slane %v937_v34, 4  ;;  %v1066_v56 = vrot.slane %v1025_v48, 2 }
 0x19e   : > { %v939_v39 = vmax.f32 %v937_v34, %v938_v37  ;;  %v1068_v61 = vsel %vm1067_vm8, %v1066_v56, %v1065_v59 }
 0x1a0   : > { %v940_v42 = vrot.slane %v939_v39, 2 }
 0x1a2   : > { %v941_v44 = vmax.f32 %v939_v39, %v940_v42 }
 0x1a4   : > { %v942_v47 = vrot.slane %v941_v44, 1 }
 0x1a6   : > { %v943_v49 = vmax.f32 %v941_v44, %v942_v47 }
 0x1a7   : > { %v848_v53 = vpop.f32.mrf.mxu2 }
 0x1a8   : > { %v1010_v54 = vadd.f32 %v1577_v51, %v943_v49 }
 0x1aa   : > { %v1026_v57 = vmax.f32 %v1010_v54, 0.0 }
 0x1ac   : > { %v1069_v60 = vrot.slane %v1026_v57, 1 }
 0x1ae   : > { %v1071_v62 = vsel %vm1070_vm9, %v1069_v60, %v1068_v61 }
 0x1af   : > { %1088 = vxpose.xlu0.b32.start [1/2] (short) %v1071_v62, 128  ;;  %v850_v63 = vpop.f32.mrf.mxu2 }
 0x1b0   : > { %v944_v0 = vmax.f32 %v848_v53, %v850_v63 }
 0x1b2   : > { %v945_v1 = vrot.slane %v944_v0, 4 }
 0x1b4   : > { %v946_v3 = vmax.f32 %v944_v0, %v945_v1 }
 0x1b6   : > { %v947_v4 = vrot.slane %v946_v3, 2 }
 0x1b7   : > { %v853_v2 = vpop.f32.mrf.mxu2 }
 0x1b8   : > { %v948_v7 = vmax.f32 %v946_v3, %v947_v4 }
 0x1ba   : > { %v949_v9 = vrot.slane %v948_v7, 1 }
 0x1bc   : > { %v950_v13 = vmax.f32 %v948_v7, %v949_v9 }
 0x1be   : > { %v1011_v16 = vadd.f32 %v1577_v51, %v950_v13 }
 0x1bf   : > { %v855_v5 = vpop.f32.mrf.mxu2 }
 0x1c0   : > { %v951_v6 = vmax.f32 %v853_v2, %v855_v5  ;;  %v1027_v21 = vmax.f32 %v1011_v16, 0.0 }
 0x1c2   : > { %v952_v8 = vrot.slane %v951_v6, 4 }
 0x1c4   : > { %v953_v52 = vmax.f32 %v951_v6, %v952_v8 }
 0x1c6   : > { %v954_v10 = vrot.slane %v953_v52, 2 }
 0x1c7   : > { %v858_v11 = vpop.f32.mrf.mxu2 }
 0x1c8   : > { %v955_v12 = vmax.f32 %v953_v52, %v954_v10 }
 0x1ca   : > { %v956_v14 = vrot.slane %v955_v12, 1 }
 0x1cc   : > { %v957_v15 = vmax.f32 %v955_v12, %v956_v14 }
 0x1ce   : > { %v1012_v17 = vadd.f32 %v1577_v51, %v957_v15 }
 0x1cf   : > { %v860_v18 = vpop.f32.mrf.mxu2 }
 0x1d0   : > { %v1028_v19 = vmax.f32 %v1012_v17, 0.0  ;;  %v958_v20 = vmax.f32 %v858_v11, %v860_v18 }
 0x1d2   : > { %v1072_v22 = vrot.slane %v1028_v19, 7  ;;  %v959_v23 = vrot.slane %v958_v20, 4 }
 0x1d4   : > { %v960_v24 = vmax.f32 %v958_v20, %v959_v23  ;;  %v1073_v25 = vsel %vm1052_vm3, %v1072_v22, %v1027_v21 }
 0x1d6   : > { %v961_v26 = vrot.slane %v960_v24, 2 }
 0x1d7   : > { %v863_v27 = vpop.f32.mrf.mxu2 }
 0x1d8   : > { %v962_v28 = vmax.f32 %v960_v24, %v961_v26 }
 0x1da   : > { %v963_v29 = vrot.slane %v962_v28, 1 }
 0x1dc   : > { %v964_v30 = vmax.f32 %v962_v28, %v963_v29 }
 0x1de   : > { %v1013_v32 = vadd.f32 %v1577_v51, %v964_v30 }
 0x1df   : > { %v865_v33 = vpop.f32.mrf.mxu2 }
 0x1e0   : > { %v1029_v31 = vmax.f32 %v1013_v32, 0.0  ;;  %v965_v34 = vmax.f32 %v863_v27, %v865_v33 }
 0x1e2   : > { %v1074_v35 = vrot.slane %v1029_v31, 6  ;;  %v966_v36 = vrot.slane %v965_v34, 4 }
 0x1e4   : > { %v967_v37 = vmax.f32 %v965_v34, %v966_v36  ;;  %v1075_v38 = vsel %vm1055_vm4, %v1074_v35, %v1073_v25 }
 0x1e6   : > { %v968_v39 = vrot.slane %v967_v37, 2 }
 0x1e7   : > { %v868_v40 = vpop.f32.mrf.mxu2 }
 0x1e8   : > { %v969_v41 = vmax.f32 %v967_v37, %v968_v39 }
 0x1ea   : > { %v970_v42 = vrot.slane %v969_v41, 1 }
 0x1ec   : > { %v971_v43 = vmax.f32 %v969_v41, %v970_v42 }
 0x1ee   : > { %v1014_v44 = vadd.f32 %v1577_v51, %v971_v43 }
 0x1ef   : > { %v870_v45 = vpop.f32.mrf.mxu2 }
 0x1f0   : > { %v1030_v46 = vmax.f32 %v1014_v44, 0.0  ;;  %v972_v54 = vmax.f32 %v868_v40, %v870_v45 }
 0x1f2   : > { %v1076_v47 = vrot.slane %v1030_v46, 5  ;;  %v973_v56 = vrot.slane %v972_v54, 4 }
 0x1f4   : > { %v1077_v48 = vsel %vm1058_vm5, %v1076_v47, %v1075_v38  ;;  %v974_v60 = vmax.f32 %v972_v54, %v973_v56 }
 0x1f6   : > { %v975_v0 = vrot.slane %v974_v60, 2 }
 0x1f7   : > { %v873_v49 = vpop.f32.mrf.mxu2 }
 0x1f8   : > { %v976_v4 = vmax.f32 %v974_v60, %v975_v0 }
 0x1fa   : > { %v977_v7 = vrot.slane %v976_v4, 1 }
 0x1fc   : > { %v978_v11 = vmax.f32 %v976_v4, %v977_v7 }
 0x1fe   : > { %v1015_v16 = vadd.f32 %v1577_v51, %v978_v11 }
 0x1ff   : > { %v875_v50 = vpop.f32.mrf.mxu2 }
 0x200   : > { %v979_v55 = vmax.f32 %v873_v49, %v875_v50  ;;  %v1031_v21 = vmax.f32 %v1015_v16, 0.0 }
 0x202   : > { %v980_v57 = vrot.slane %v979_v55, 4  ;;  %v1078_v26 = vrot.slane %v1031_v21, 4 }
 0x204   : > { %v981_v61 = vmax.f32 %v979_v55, %v980_v57  ;;  %v1079_v32 = vsel %vm1061_vm6, %v1078_v26, %v1077_v48 }
 0x206   : > { %v982_v1 = vrot.slane %v981_v61, 2 }
 0x207   : > { %v878_v53 = vpop.f32.mrf.mxu2 }
 0x208   : > { %v983_v5 = vmax.f32 %v981_v61, %v982_v1 }
 0x20a   : > { %v984_v8 = vrot.slane %v983_v5, 1 }
 0x20c   : > { %v985_v12 = vmax.f32 %v983_v5, %v984_v8 }
 0x20e   : > { %v1016_v17 = vadd.f32 %v1577_v51, %v985_v12 }
 0x20f   : > { %v880_v58 = vpop.f32.mrf.mxu2 }
 0x210   : > { %v986_v59 = vmax.f32 %v878_v53, %v880_v58  ;;  %v1032_v22 = vmax.f32 %v1016_v17, 0.0 }
 0x212   : > { %v987_v62 = vrot.slane %v986_v59, 4  ;;  %v1080_v28 = vrot.slane %v1032_v22, 3 }
 0x214   : > { %v988_v63 = vmax.f32 %v986_v59, %v987_v62  ;;  %v1081_v33 = vsel %vm1064_vm7, %v1080_v28, %v1079_v32 }
 0x216   : > { %v989_v2 = vrot.slane %v988_v63, 2 }
 0x217   : > { %v883_v3 = vpop.f32.mrf.mxu2 }
 0x218   : > { %v990_v6 = vmax.f32 %v988_v63, %v989_v2 }
 0x21a   : > { %v991_v52 = vrot.slane %v990_v6, 1 }
 0x21c   : > { %v992_v14 = vmax.f32 %v990_v6, %v991_v52 }
 0x21e   : > { %v1017_v19 = vadd.f32 %v1577_v51, %v992_v14 }
 0x21f   : > { %v885_v9 = vpop.f32.mrf.mxu2 }
 0x220   : > { %v993_v10 = vmax.f32 %v883_v3, %v885_v9  ;;  %v1033_v24 = vmax.f32 %v1017_v19, 0.0 }
 0x222   : > { %v994_v13 = vrot.slane %v993_v10, 4  ;;  %v1082_v29 = vrot.slane %v1033_v24, 2 }
 0x224   : > { %v995_v15 = vmax.f32 %v993_v10, %v994_v13  ;;  %v1083_v34 = vsel %vm1067_vm8, %v1082_v29, %v1081_v33 }
 0x226   : > { %v996_v18 = vrot.slane %v995_v15, 2 }
 0x228   : > { %v997_v20 = vmax.f32 %v995_v15, %v996_v18 }
 0x22a   : > { %v998_v23 = vrot.slane %v997_v20, 1 }
 0x22c   : > { %v999_v25 = vmax.f32 %v997_v20, %v998_v23 }
 0x22e   : > { %v1018_v27 = vadd.f32 %v1577_v51, %v999_v25 }
 0x230   : > { %v1034_v30 = vmax.f32 %v1018_v27, 0.0 }
 0x232   : > { %v1084_v31 = vrot.slane %v1034_v30, 1 }
 0x234   : > { %v1085_v35 = vsel %vm1070_vm9, %v1084_v31, %v1083_v34 }
 0x235   : > { %1089 = vxpose.xlu0.b32.end [2/2] (short) %v1085_v35, 128 }
 0x2d1   : > { %v1104_v51 = vpop.trf.xlu0 }
 0x2d2   : > { %1121 = vst.msk [vmem:[%s1627_s30] sm:$0xff] %vm1120_vm10, %v1104_v51 }
 0x2d9   : > { %v1105_v36 = vpop.trf.xlu0 }
 0x2da   : > { %1122 = vst.msk [vmem:[%s1627_s30 + $0x8] sm:$0xff] %vm1120_vm10, %v1105_v36 }
 0x2e1   : > { %v1106_v37 = vpop.trf.xlu0 }
 0x2e2   : > { %1123 = vst.msk [vmem:[%s1627_s30 + $0x10] sm:$0xff] %vm1120_vm10, %v1106_v37 }
 0x2e9   : > { %v1107_v38 = vpop.trf.xlu0 }
 0x2ea   : > { %1124 = vst.msk [vmem:[%s1627_s30 + $0x18] sm:$0xff] %vm1120_vm10, %v1107_v38 }
 0x2f1   : > { %v1108_v39 = vpop.trf.xlu0 }
 0x2f2   : > { %1125 = vst.msk [vmem:[%s1627_s30 + $0x20] sm:$0xff] %vm1120_vm10, %v1108_v39 }
 0x2f9   : > { %v1109_v40 = vpop.trf.xlu0 }
 0x2fa   : > { %1126 = vst.msk [vmem:[%s1627_s30 + $0x28] sm:$0xff] %vm1120_vm10, %v1109_v40 }
 0x301   : > { %v1110_v41 = vpop.trf.xlu0 }
 0x302   : > { %1127 = vst.msk [vmem:[%s1627_s30 + $0x30] sm:$0xff] %vm1120_vm10, %v1110_v41 }
 0x309   : > { %v1111_v42 = vpop.trf.xlu0 }
 0x30a   : > { %1128 = vst.msk [vmem:[%s1627_s30 + $0x38] sm:$0xff] %vm1120_vm10, %v1111_v42 }
 0x311   : > { %v1112_v43 = vpop.trf.xlu0 }
 0x312   : > { %1129 = vst.msk [vmem:[%s1627_s30 + $0x40] sm:$0xff] %vm1120_vm10, %v1112_v43 }
 0x319   : > { %v1113_v44 = vpop.trf.xlu0 }
 0x31a   : > { %1130 = vst.msk [vmem:[%s1627_s30 + $0x48] sm:$0xff] %vm1120_vm10, %v1113_v44 }
 0x321   : > { %v1114_v45 = vpop.trf.xlu0 }
 0x322   : > { %1131 = vst.msk [vmem:[%s1627_s30 + $0x50] sm:$0xff] %vm1120_vm10, %v1114_v45 }
 0x329   : > { %v1115_v46 = vpop.trf.xlu0 }
 0x32a   : > { %1132 = vst.msk [vmem:[%s1627_s30 + $0x58] sm:$0xff] %vm1120_vm10, %v1115_v46 }
 0x331   : > { %v1116_v47 = vpop.trf.xlu0 }
 0x332   : > { %1133 = vst.msk [vmem:[%s1627_s30 + $0x60] sm:$0xff] %vm1120_vm10, %v1116_v47 }
 0x339   : > { %v1117_v48 = vpop.trf.xlu0 }
 0x33a   : > { %1134 = vst.msk [vmem:[%s1627_s30 + $0x68] sm:$0xff] %vm1120_vm10, %v1117_v48 }
 0x341   : > { %v1118_v49 = vpop.trf.xlu0 }
 0x342   : > { %1135 = vst.msk [vmem:[%s1627_s30 + $0x70] sm:$0xff] %vm1120_vm10, %v1118_v49 }
 0x349   : > { %v1119_v50 = vpop.trf.xlu0 }
 0x34a   : > { %1136 = vst.msk [vmem:[%s1627_s30 + $0x78] sm:$0xff] %vm1120_vm10, %v1119_v50 }
 0x34b PF: > { %s15_s20 = sadd.s32 1, %s1427_s20   ;;  %s1676_s18 = smov %s1423_s19 }
 0x34c   : > { %p12_p5 = scmp.ge.s32.totalorder %s15_s20, 4   ;;  %s1677_s19 = smov %s1679_s21 }
 0x34e   :  { %14 = sbr.rel (!%p12_p5) target bundleno = 2 (0x2), region = 70 }

</bundles_post_ra>
